<compile_context>
chip_gen: v7x
topology: tpu7x:2x2x1
jax: 0.10.0
libtpu: 0.0.40
codegen_flags: <defaults>
</compile_context>

<pallas_src>
import jax
import jax.numpy as jnp
from jax.experimental import pallas as pl
from jax.experimental.pallas import tpu as pltpu

PAD = 128            # lane width: padded feature / hidden / output slab width
TM = 256             # node-row tile
TK = 512             # adjacency contraction tile
assert TK % TM == 0


def _round_up(x, m):
    return (x + m - 1) // m * m


# --------------------------------------------------------------------------
# Fused kernel: row tile i, contraction tile k
# --------------------------------------------------------------------------
def stgcn_kernel(adj_ref, packed_ref, wg_ref, bg_ref, w1_ref, w2_ref, out_ref):
    """out[i] = relu( relu( [relu(A@XW + bg) | packed] @ W1 ) | packed] @ W2 )

    A @ XW is K-tiled; packed_ref is the whole VMEM-resident [N_pad, PAD] slab,
    XW[k] = packed[k] @ Wg is recomputed per step (free under adjacency DMA).
    The concat splits and fc biases are folded into w1_ref / w2_ref via the
    ones column of the packed slab.
    """
    i = pl.program_id(0)
    k = pl.program_id(1)

    @pl.when(k == 0)
    def _():
        out_ref[...] = jnp.zeros_like(out_ref)

    # GCN feature transform for this contraction slab, then aggregate.
    k_start = pl.multiple_of(k * TK, TK)
    p_k = packed_ref[pl.ds(k_start, TK), :]                       # (TK, PAD) bf16
    xw_k = jnp.dot(p_k, wg_ref[...],
                   preferred_element_type=jnp.float32).astype(jnp.bfloat16)
    out_ref[...] += jnp.dot(adj_ref[...], xw_k,
                            preferred_element_type=jnp.float32)   # f32 accumulate

    @pl.when(k == pl.num_programs(1) - 1)
    def _():
        i_start = pl.multiple_of(i * TM, TM)
        p_i = packed_ref[pl.ds(i_start, TM), :]                   # (TM, PAD) bf16
        h = jnp.maximum(out_ref[...] + bg_ref[...], 0.0)          # GCN bias + ReLU
        hp = jnp.concatenate([h.astype(jnp.bfloat16), p_i], axis=-1)  # (TM, 256)
        z = jnp.maximum(jnp.dot(hp, w1_ref[...],
                                preferred_element_type=jnp.float32), 0.0)
        zp = jnp.concatenate([z.astype(jnp.bfloat16), p_i], axis=-1)  # (TM, 256)
        y = jnp.dot(zp, w2_ref[...], preferred_element_type=jnp.float32)
        out_ref[...] = jnp.maximum(y, 0.0)


# --------------------------------------------------------------------------
# Host-side packing (runs once under jit; pure layout work)
# --------------------------------------------------------------------------
def pack_inputs(adj, x, temporal, n_pad):
    """Pad adjacency to [n_pad, n_pad] bf16; pack [X | temporal | 0... | 1] into a
    lane-dense [n_pad, 128] bf16 slab (ones column feeds the folded fc biases)."""
    n, f = x.shape
    t = temporal.shape[1]
    assert f + t <= PAD - 1, "packed feature slab overflow"
    adj_p = jnp.zeros((n_pad, n_pad), jnp.float32).at[:n, :n].set(adj)
    packed = jnp.zeros((n_pad, PAD), jnp.float32)
    packed = packed.at[:n, :f].set(x)
    packed = packed.at[:n, f:f + t].set(temporal)
    packed = packed.at[:, PAD - 1].set(1.0)                  # ones column -> biases
    return adj_p.astype(jnp.bfloat16), packed.astype(jnp.bfloat16)


def pack_params(params, node_features, temporal_dim):
    """Zero-pad weights into 128-wide slabs; fold the torch.cat splits and the fc
    biases (via the ones column of the packed slab) into single (256,128) mats."""
    wg, bg, w1, b1, w2, b2 = params
    f, t = node_features, temporal_dim
    h = wg.shape[1]
    assert h <= PAD

    wg_p = jnp.zeros((PAD, PAD), jnp.float32).at[:f, :h].set(wg)
    bg_p = jnp.zeros((1, PAD), jnp.float32).at[0, :h].set(bg)     # stays f32

    # fc1 input = lane-concat [h_slab(128) | packed_slab(128)]
    w1_p = jnp.zeros((2 * PAD, PAD), jnp.float32)
    w1_p = w1_p.at[:h, :h].set(w1[:h])                            # hidden rows
    w1_p = w1_p.at[PAD + f:PAD + f + t, :h].set(w1[h:])           # temporal rows
    w1_p = w1_p.at[2 * PAD - 1, :h].set(b1)                       # bias via ones col

    # fc2 input = lane-concat [z_slab(128) | packed_slab(128)]
    w2_p = jnp.zeros((2 * PAD, PAD), jnp.float32)
    w2_p = w2_p.at[:h, :1].set(w2[:h])                            # hidden rows
    w2_p = w2_p.at[PAD:PAD + f, :1].set(w2[h:])                   # X rows
    w2_p = w2_p.at[2 * PAD - 1, :1].set(b2)                       # bias via ones col

    return (wg_p.astype(jnp.bfloat16), bg_p,
            w1_p.astype(jnp.bfloat16), w2_p.astype(jnp.bfloat16))


# --------------------------------------------------------------------------
# Forward wrapper
# --------------------------------------------------------------------------
@jax.jit
def stgcn_forward(adj, x, temporal, params):
    n, f = x.shape
    t = temporal.shape[1]
    n_pad = _round_up(n, TK)                     # divisible by both TM and TK

    adj_p, packed = pack_inputs(adj, x, temporal, n_pad)
    wg_p, bg_p, w1_p, w2_p = pack_params(params, f, t)

    grid_i = n_pad // TM
    grid_k = n_pad // TK

    flops = (2 * n_pad * n_pad * PAD                    # A_hat @ XW
             + 2 * grid_i * n_pad * PAD * PAD           # XW recompute per row tile
             + 8 * n_pad * PAD * PAD)                   # fc1 + fc2 epilogue
    bytes_accessed = (adj_p.size * 2 + packed.size * 2
                      + (wg_p.size + w1_p.size + w2_p.size) * 2
                      + bg_p.size * 4 + n_pad * PAD * 4)

    out_pad = pl.pallas_call(
        stgcn_kernel,
        out_shape=jax.ShapeDtypeStruct((n_pad, PAD), jnp.float32),
        grid=(grid_i, grid_k),
        in_specs=[
            pl.BlockSpec((TM, TK), lambda i, k: (i, k)),        # adjacency tile (bf16)
            pl.BlockSpec((n_pad, PAD), lambda i, k: (0, 0)),    # packed feats, resident
            pl.BlockSpec((PAD, PAD), lambda i, k: (0, 0)),      # Wg
            pl.BlockSpec((1, PAD), lambda i, k: (0, 0)),        # GCN bias (f32)
            pl.BlockSpec((2 * PAD, PAD), lambda i, k: (0, 0)),  # W1 (concat + b1 folded)
            pl.BlockSpec((2 * PAD, PAD), lambda i, k: (0, 0)),  # W2 (concat + b2 folded)
        ],
        out_specs=pl.BlockSpec((TM, PAD), lambda i, k: (i, 0)),
        compiler_params=pltpu.CompilerParams(
            dimension_semantics=("parallel", "arbitrary"),
            vmem_limit_bytes=48 * 1024 * 1024),       # headroom, < v7x 64 MiB physical
        cost_estimate=pl.CostEstimate(flops=flops, transcendentals=0,
                                      bytes_accessed=bytes_accessed),
    )(adj_p, packed, wg_p, bg_p, w1_p, w2_p)

    # lane-dense padded slab -> real [N, 1] output
    return out_pad[:n, :1]


# --------------------------------------------------------------------------
# Glue: normalized adjacency, params, pure-JAX reference
# --------------------------------------------------------------------------
def gcn_normalized_adjacency(edge_index, num_nodes):
    """Dense symmetric-normalized adjacency with self loops (PyG gcn_norm)."""
    src, dst = edge_index
    a = jnp.zeros((num_nodes, num_nodes), jnp.float32).at[src, dst].set(1.0)
    a = a + jnp.eye(num_nodes, dtype=jnp.float32)
    deg = a.sum(axis=1)
    d_inv_sqrt = jnp.where(deg > 0, jax.lax.rsqrt(deg), 0.0)
    return d_inv_sqrt[:, None] * a * d_inv_sqrt[None, :]


def init_params(key, node_features, hidden_dim, temporal_dim):
    ks = jax.random.split(key, 6)
    s = 0.1
    wg = s * jax.random.normal(ks[0], (node_features, hidden_dim), jnp.float32)
    bg = s * jax.random.normal(ks[1], (hidden_dim,), jnp.float32)
    w1 = s * jax.random.normal(ks[2], (hidden_dim + temporal_dim, hidden_dim),
                               jnp.float32)
    b1 = s * jax.random.normal(ks[3], (hidden_dim,), jnp.float32)
    w2 = s * jax.random.normal(ks[4], (hidden_dim + node_features, 1),
                               jnp.float32)
    b2 = s * jax.random.normal(ks[5], (1,), jnp.float32)
    return (wg, bg, w1, b1, w2, b2)


def reference_forward(adj, x, temporal, params):
    wg, bg, w1, b1, w2, b2 = params
    h = jnp.maximum(adj @ (x @ wg) + bg, 0.0)
    z = jnp.maximum(jnp.concatenate([h, temporal], axis=-1) @ w1 + b1, 0.0)
    y = jnp.maximum(jnp.concatenate([z, x], axis=-1) @ w2 + b2, 0.0)
    return y


# --------------------------------------------------------------------------
if __name__ == "__main__":
    NODE_FEATURES = 4
    HIDDEN_DIM = 32
    TEMPORAL_DIM = 10
    NUM_NODES = 16

    key = jax.random.PRNGKey(0)
    k_x, k_t, k_p = jax.random.split(key, 3)

    x = jax.random.normal(k_x, (NUM_NODES, NODE_FEATURES), jnp.float32)
    temporal = jax.random.normal(k_t, (NUM_NODES, TEMPORAL_DIM), jnp.float32)

    # deterministic ring graph (bidirectional edges)
    idx = jnp.arange(NUM_NODES)
    src = jnp.concatenate([idx, (idx + 1) % NUM_NODES])
    dst = jnp.concatenate([(idx + 1) % NUM_NODES, idx])
    edge_index = jnp.stack([src, dst])

    adj = gcn_normalized_adjacency(edge_index, NUM_NODES)
    params = init_params(k_p, NODE_FEATURES, HIDDEN_DIM, TEMPORAL_DIM)

    out = stgcn_forward(adj, x, temporal, params)
    out = jax.block_until_ready(out)

    ref = reference_forward(adj, x, temporal, params)
    assert out.shape == (NUM_NODES, 1)
    # bf16 inputs / f32 accumulation vs pure-f32 reference -> relaxed tolerance
    assert jnp.allclose(out, ref, atol=2e-2, rtol=2e-2), "mismatch vs JAX reference"

    print("KERNEL_OK")
</pallas_src>

<mosaic_0001>
module attributes {stable_mosaic.version = 11 : i64} {
  func.func @stgcn_kernel(%arg0: i32, %arg1: i32, %arg2: memref<256x512xbf16, #tpu.memory_space<vmem>>, %arg3: memref<512x128xbf16, #tpu.memory_space<vmem>>, %arg4: memref<128x128xbf16, #tpu.memory_space<vmem>>, %arg5: memref<1x128xf32, #tpu.memory_space<vmem>>, %arg6: memref<256x128xbf16, #tpu.memory_space<vmem>>, %arg7: memref<256x128xbf16, #tpu.memory_space<vmem>>, %arg8: memref<256x128xf32, #tpu.memory_space<vmem>>) attributes {dimension_semantics = [#tpu.dimension_semantics<parallel>, #tpu.dimension_semantics<arbitrary>], iteration_bounds = array<i64: 2, 1>, scalar_prefetch = 0 : i64, scratch_operands = 0 : i64, tpu.core_type = #tpu.core_type<tc>, window_params = [{transform_indices = @transform_0, window_bounds = array<i64: 256, 512>}, {pipeline_mode = #tpu.pipeline_mode<synchronous>, transform_indices = @transform_1, window_bounds = array<i64: 512, 128>}, {pipeline_mode = #tpu.pipeline_mode<synchronous>, transform_indices = @transform_2, window_bounds = array<i64: 128, 128>}, {pipeline_mode = #tpu.pipeline_mode<synchronous>, transform_indices = @transform_3, window_bounds = array<i64: 1, 128>}, {pipeline_mode = #tpu.pipeline_mode<synchronous>, transform_indices = @transform_4, window_bounds = array<i64: 256, 128>}, {pipeline_mode = #tpu.pipeline_mode<synchronous>, transform_indices = @transform_5, window_bounds = array<i64: 256, 128>}, {transform_indices = @transform_6, window_bounds = array<i64: 256, 128>}]} {
    %c0_i32 = arith.constant 0 : i32
    %0 = arith.cmpi eq, %arg1, %c0_i32 : i32
    %1 = arith.extui %0 : i1 to i32
    %c0_i32_0 = arith.constant 0 : i32
    %2 = arith.cmpi ne, %1, %c0_i32_0 : i32
    scf.if %2 {
      %cst_12 = arith.constant 0.000000e+00 : f32
      %18 = vector.broadcast %cst_12 : f32 to vector<256x128xf32>
      %c0_13 = arith.constant 0 : index
      %c0_14 = arith.constant 0 : index
      %19 = vector.load %arg8[%c0_13, %c0_14] : memref<256x128xf32, #tpu.memory_space<vmem>>, vector<256x128xf32>
      tpu.vector_store %arg8[%c0_13, %c0_14], %18 {strides = array<i32>} : memref<256x128xf32, #tpu.memory_space<vmem>>, vector<256x128xf32>,
    } else {
    }
    %c512_i32 = arith.constant 512 : i32
    %3 = arith.muli %arg1, %c512_i32 : i32
    %4 = tpu.assume_multiple %3, 512 : i32
    %5 = arith.index_cast %4 : i32 to index
    %c0 = arith.constant 0 : index
    %6 = vector.load %arg3[%5, %c0] : memref<512x128xbf16, #tpu.memory_space<vmem>>, vector<512x128xbf16>
    %c0_1 = arith.constant 0 : index
    %c0_2 = arith.constant 0 : index
    %7 = vector.load %arg4[%c0_1, %c0_2] : memref<128x128xbf16, #tpu.memory_space<vmem>>, vector<128x128xbf16>
    %cst = arith.constant dense<0.000000e+00> : vector<512x128xf32>
    %8 = tpu.matmul %6, %7, %cst {dimension_numbers = #tpu.dot_dimension_numbers<[1], [0], [0], [1], [0, 0, 1, 1], [], []>} : vector<512x128xbf16>, vector<128x128xbf16>, vector<512x128xf32> -> vector<512x128xf32>
    %9 = arith.truncf %8 : vector<512x128xf32> to vector<512x128xbf16>
    %c0_3 = arith.constant 0 : index
    %c0_4 = arith.constant 0 : index
    %10 = vector.load %arg8[%c0_3, %c0_4] : memref<256x128xf32, #tpu.memory_space<vmem>>, vector<256x128xf32>
    %c0_5 = arith.constant 0 : index
    %c0_6 = arith.constant 0 : index
    %11 = vector.load %arg2[%c0_5, %c0_6] : memref<256x512xbf16, #tpu.memory_space<vmem>>, vector<256x512xbf16>
    %cst_7 = arith.constant dense<0.000000e+00> : vector<256x128xf32>
    %12 = tpu.matmul %11, %9, %cst_7 {dimension_numbers = #tpu.dot_dimension_numbers<[1], [0], [0], [1], [0, 0, 1, 1], [], []>} : vector<256x512xbf16>, vector<512x128xbf16>, vector<256x128xf32> -> vector<256x128xf32>
    %13 = arith.addf %10, %12 : vector<256x128xf32>
    %c0_8 = arith.constant 0 : index
    %c0_9 = arith.constant 0 : index
    %14 = vector.load %arg8[%c0_8, %c0_9] : memref<256x128xf32, #tpu.memory_space<vmem>>, vector<256x128xf32>
    tpu.vector_store %arg8[%c0_8, %c0_9], %13 {strides = array<i32>} : memref<256x128xf32, #tpu.memory_space<vmem>>, vector<256x128xf32>,
    %c0_i32_10 = arith.constant 0 : i32
    %15 = arith.cmpi eq, %arg1, %c0_i32_10 : i32
    %16 = arith.extui %15 : i1 to i32
    %c0_i32_11 = arith.constant 0 : i32
    %17 = arith.cmpi ne, %16, %c0_i32_11 : i32
    scf.if %17 {
      %c256_i32 = arith.constant 256 : i32
      %18 = arith.muli %arg0, %c256_i32 : i32
      %19 = tpu.assume_multiple %18, 256 : i32
      %20 = arith.index_cast %19 : i32 to index
      %c0_12 = arith.constant 0 : index
      %21 = vector.load %arg3[%20, %c0_12] : memref<512x128xbf16, #tpu.memory_space<vmem>>, vector<256x128xbf16>
      %c0_13 = arith.constant 0 : index
      %c0_14 = arith.constant 0 : index
      %22 = vector.load %arg8[%c0_13, %c0_14] : memref<256x128xf32, #tpu.memory_space<vmem>>, vector<256x128xf32>
      %c0_15 = arith.constant 0 : index
      %c0_16 = arith.constant 0 : index
      %23 = vector.load %arg5[%c0_15, %c0_16] : memref<1x128xf32, #tpu.memory_space<vmem>>, vector<1x128xf32>
      %24 = vector.broadcast %23 : vector<1x128xf32> to vector<256x128xf32>
      %25 = arith.addf %22, %24 : vector<256x128xf32>
      %cst_17 = arith.constant 0.000000e+00 : f32
      %26 = vector.broadcast %cst_17 : f32 to vector<256x128xf32>
      %27 = arith.maximumf %25, %26 : vector<256x128xf32>
      %28 = arith.truncf %27 : vector<256x128xf32> to vector<256x128xbf16>
      %29 = tpu.concatenate %28, %21 in 1 : vector<256x128xbf16>, vector<256x128xbf16> -> vector<256x256xbf16>
      %c0_18 = arith.constant 0 : index
      %c0_19 = arith.constant 0 : index
      %30 = vector.load %arg6[%c0_18, %c0_19] : memref<256x128xbf16, #tpu.memory_space<vmem>>, vector<256x128xbf16>
      %cst_20 = arith.constant dense<0.000000e+00> : vector<256x128xf32>
      %31 = tpu.matmul %29, %30, %cst_20 {dimension_numbers = #tpu.dot_dimension_numbers<[1], [0], [0], [1], [0, 0, 1, 1], [], []>} : vector<256x256xbf16>, vector<256x128xbf16>, vector<256x128xf32> -> vector<256x128xf32>
      %cst_21 = arith.constant 0.000000e+00 : f32
      %32 = vector.broadcast %cst_21 : f32 to vector<256x128xf32>
      %33 = arith.maximumf %31, %32 : vector<256x128xf32>
      %34 = arith.truncf %33 : vector<256x128xf32> to vector<256x128xbf16>
      %35 = tpu.concatenate %34, %21 in 1 : vector<256x128xbf16>, vector<256x128xbf16> -> vector<256x256xbf16>
      %c0_22 = arith.constant 0 : index
      %c0_23 = arith.constant 0 : index
      %36 = vector.load %arg7[%c0_22, %c0_23] : memref<256x128xbf16, #tpu.memory_space<vmem>>, vector<256x128xbf16>
      %cst_24 = arith.constant dense<0.000000e+00> : vector<256x128xf32>
      %37 = tpu.matmul %35, %36, %cst_24 {dimension_numbers = #tpu.dot_dimension_numbers<[1], [0], [0], [1], [0, 0, 1, 1], [], []>} : vector<256x256xbf16>, vector<256x128xbf16>, vector<256x128xf32> -> vector<256x128xf32>
      %cst_25 = arith.constant 0.000000e+00 : f32
      %38 = vector.broadcast %cst_25 : f32 to vector<256x128xf32>
      %39 = arith.maximumf %37, %38 : vector<256x128xf32>
      %c0_26 = arith.constant 0 : index
      %c0_27 = arith.constant 0 : index
      %40 = vector.load %arg8[%c0_26, %c0_27] : memref<256x128xf32, #tpu.memory_space<vmem>>, vector<256x128xf32>
      tpu.vector_store %arg8[%c0_26, %c0_27], %39 {strides = array<i32>} : memref<256x128xf32, #tpu.memory_space<vmem>>, vector<256x128xf32>,
    } else {
    }
    return
  }
  func.func @transform_0(%arg0: i32, %arg1: i32) -> (i32, i32) {
    %c0_i32 = arith.constant 0 : i32
    return %arg0, %arg1 : i32, i32
  }
  func.func @transform_1(%arg0: i32, %arg1: i32) -> (i32, i32) {
    %c0_i32 = arith.constant 0 : i32
    %c0_i32_0 = arith.constant 0 : i32
    %c0_i32_1 = arith.constant 0 : i32
    return %c0_i32, %c0_i32_0 : i32, i32
  }
  func.func @transform_2(%arg0: i32, %arg1: i32) -> (i32, i32) {
    %c0_i32 = arith.constant 0 : i32
    %c0_i32_0 = arith.constant 0 : i32
    %c0_i32_1 = arith.constant 0 : i32
    return %c0_i32, %c0_i32_0 : i32, i32
  }
  func.func @transform_3(%arg0: i32, %arg1: i32) -> (i32, i32) {
    %c0_i32 = arith.constant 0 : i32
    %c0_i32_0 = arith.constant 0 : i32
    %c0_i32_1 = arith.constant 0 : i32
    return %c0_i32, %c0_i32_0 : i32, i32
  }
  func.func @transform_4(%arg0: i32, %arg1: i32) -> (i32, i32) {
    %c0_i32 = arith.constant 0 : i32
    %c0_i32_0 = arith.constant 0 : i32
    %c0_i32_1 = arith.constant 0 : i32
    return %c0_i32, %c0_i32_0 : i32, i32
  }
  func.func @transform_5(%arg0: i32, %arg1: i32) -> (i32, i32) {
    %c0_i32 = arith.constant 0 : i32
    %c0_i32_0 = arith.constant 0 : i32
    %c0_i32_1 = arith.constant 0 : i32
    return %c0_i32, %c0_i32_0 : i32, i32
  }
  func.func @transform_6(%arg0: i32, %arg1: i32) -> (i32, i32) {
    %c0_i32 = arith.constant 0 : i32
    %c0_i32_0 = arith.constant 0 : i32
    return %arg0, %c0_i32 : i32, i32
  }
}

</mosaic_0001>

<bundles_post_ra>
// kernel: stgcn_forward.1
= control target key start
LH: loop header
LB: loop body
LE: loop exit
PB: predicated region body
PF: predicated region fallthrough
CT: control target
= control target key end

     0   :  { %s3811_s21 = smov 0   ;;  %s3813_s22 = smov 0   ;;  %s4400_s0 = inlined_call_operand.vmem [shape: bf16[512,512], index: 0, kind: input, shape index: {}]   ;;  %s4401_s1 = inlined_call_operand.vmem [shape: bf16[512,128], index: 1, kind: input, shape index: {}]   ;;  %s4402_s2 = inlined_call_operand.vmem [shape: bf16[128,128], index: 2, kind: input, shape index: {}]   ;;  %s4403_s3 = inlined_call_operand.vmem [shape: f32[1,128], index: 3, kind: input, shape index: {}]   ;;  %s4404_s4 = inlined_call_operand.vmem [shape: bf16[256,128], index: 4, kind: input, shape index: {}]   ;;  %s4405_s5 = inlined_call_operand.vmem [shape: bf16[256,128], index: 5, kind: input, shape index: {}]   ;;  %s4406_s6 = inlined_call_operand.vmem [shape: f32[512,128], index: 6, kind: output, shape index: {}]  }
   0x1   :  { %s3815_s23 = smov 0  }
   0x2 LB: > { %s28_s24 = sadd.s32 1, %s3770_s22  ;;  %p2795_p0 = scmp.ge.s32.totalorder %s3774_s23, 1  ;;  %s3774_s23 = sphi %s3815_s23, %s16_s23   ;;  %s3770_s22 = sphi %s3813_s22, %s4408_s22   ;;  %s3766_s21 = sphi %s3811_s21, %s4407_s21  }
   0x3   : > { %p30_p1 = scmp.ge.s32.totalorder %s28_s24, 2  ;;  %p233_p2 = scmp.lt.s32.totalorder %s3774_s23, 3 }
   0x5   : > { %s4410_s24 = smov (%p30_p1, %s28_s24), 0  ;;  %p234_p3 = pnand %p2795_p0, %p233_p2 }
   0x6   : > { %v3568_v0 = vld [vmem:[%s4402_s2] sm:$0xff] (!%p234_p3)   ;;  %v3569_v1 = vld [vmem:[%s4402_s2 + $0x8] sm:$0xff] (!%p234_p3)   ;;  %v3570_v2 = vld [vmem:[%s4402_s2 + $0x10] sm:$0xff] (!%p234_p3)   ;;  %s2796_s25 = sshll.u32 (!%p234_p3), %s3766_s21, 5  ;;  %s2905_s16 = sshll.u32 (!%p234_p3), %s3766_s21, 8 }
   0x7   : > { %237 = sbr.rel (%p234_p3) target bundleno = 1106 (0x452), region = 44  ;;  %3447 = vmatprep.subr.bf16.mxu0 (!%p234_p3), %v3568_v0  ;;  %3527 = vmatprep.subr.bf16.mxu1 (!%p234_p3), %v3568_v0  ;;  %v3571_v3 = vld [vmem:[%s4402_s2 + $0x18] sm:$0xff] (!%p234_p3)   ;;  %v3576_v4 = vld [vmem:[%s4401_s1] sm:$0xff] (!%p234_p3)   ;;  %v3573_v7 = vld [vmem:[%s4402_s2 + $0x28] sm:$0xff] (!%p234_p3)   ;;  %p270_p4 = scmp.lt.s32.totalorder (!%p234_p3), %s2796_s25, 63 }
   0x8   : > { %3448 = vmatpush3.bf16.msra.mxu0 (!%p234_p3), %v3568_v0  ;;  %3535 = vmatpush3.bf16.msra.mxu1 (!%p234_p3), %v3568_v0  ;;  %v3577_v5 = vld [vmem:[%s4401_s1 + $0x80] sm:$0xff] (!%p234_p3)   ;;  %v3574_v8 = vld [vmem:[%s4402_s2 + $0x30] sm:$0xff] (!%p234_p3)   ;;  %v3575_v9 = vld [vmem:[%s4402_s2 + $0x38] sm:$0xff] (!%p234_p3)   ;;  %s1775_s19 = sshra.s32 (!%p234_p3), %s2905_s16, 3 }
   0x9   : > { %3449 = vmatprep.subr.bf16.mxu0 (!%p234_p3), %v3569_v1  ;;  %3528 = vmatprep.subr.bf16.mxu1 (!%p234_p3), %v3569_v1  ;;  %v3572_v6 = vld [vmem:[%s4402_s2 + $0x20] sm:$0xff] (!%p234_p3)   ;;  %v3578_v10 = vld [vmem:[%s4401_s1 + $0x8] sm:$0xff] (!%p234_p3)   ;;  %v3580_v12 = vld [vmem:[%s4401_s1 + $0x10] sm:$0xff] (!%p234_p3)   ;;  %s2906_s27 = sshll.u32 (!%p234_p3), %s1775_s19, 2 }
   0xa   : > { %3463 = vmatprep.mubr.bf16.mxu0 (!%p234_p3), %v3576_v4  ;;  %3495 = vmatprep.mubr.bf16.mxu1 (!%p234_p3), %v3577_v5  ;;  %v3579_v11 = vld [vmem:[%s4401_s1 + $0x88] sm:$0xff] (!%p234_p3)   ;;  %v3581_v13 = vld [vmem:[%s4401_s1 + $0x90] sm:$0xff] (!%p234_p3)   ;;  %v3582_v14 = vld [vmem:[%s4401_s1 + $0x18] sm:$0xff] (!%p234_p3)   ;;  %s4180_s21 = scalar_lea.vmem (!%p234_p3), %s4401_s1, %s2906_s27 }
   0xb   : > { %v3583_v15 = vld [vmem:[%s4401_s1 + $0x98] sm:$0xff] (!%p234_p3)   ;;  %v3584_v16 = vld [vmem:[%s4401_s1 + $0x20] sm:$0xff] (!%p234_p3)   ;;  %v3586_v18 = vld [vmem:[%s4401_s1 + $0x28] sm:$0xff] (!%p234_p3)  }
   0xc   : > { %3450 = vmatpush3.bf16.msra.mxu0 (!%p234_p3), %v3569_v1  ;;  %3536 = vmatpush3.bf16.msra.mxu1 (!%p234_p3), %v3569_v1  ;;  %v3585_v17 = vld [vmem:[%s4401_s1 + $0xa0] sm:$0xff] (!%p234_p3)   ;;  %v3587_v19 = vld [vmem:[%s4401_s1 + $0xa8] sm:$0xff] (!%p234_p3)   ;;  %v3588_v20 = vld [vmem:[%s4401_s1 + $0x30] sm:$0xff] (!%p234_p3)  }
   0xd   : > { %3451 = vmatprep.subr.bf16.mxu0 (!%p234_p3), %v3570_v2  ;;  %3529 = vmatprep.subr.bf16.mxu1 (!%p234_p3), %v3570_v2  ;;  %v3589_v21 = vld [vmem:[%s4401_s1 + $0xb0] sm:$0xff] (!%p234_p3)   ;;  %v3590_v22 = vld [vmem:[%s4401_s1 + $0x38] sm:$0xff] (!%p234_p3)   ;;  %v3592_v24 = vld [vmem:[%s4401_s1 + $0x40] sm:$0xff] (!%p234_p3)  }
   0xe   : > { %v3591_v23 = vld [vmem:[%s4401_s1 + $0xb8] sm:$0xff]   ;;  %v3593_v25 = vld [vmem:[%s4401_s1 + $0xc0] sm:$0xff]   ;;  %v3594_v26 = vld [vmem:[%s4401_s1 + $0x48] sm:$0xff]   ;;  %s4412_s25 = smov (!%p270_p4, %s2796_s25), 63 }
   0xf   : > { %v3595_v27 = vld [vmem:[%s4401_s1 + $0xc8] sm:$0xff]   ;;  %v3596_v28 = vld [vmem:[%s4401_s1 + $0x50] sm:$0xff]   ;;  %v3598_v30 = vld [vmem:[%s4401_s1 + $0x58] sm:$0xff]   ;;  %s2958_s26 = sshll.u32 %s4412_s25, 4 }
  0x10   : > { %3452 = vmatpush3.bf16.msra.mxu0 %v3570_v2  ;;  %3537 = vmatpush3.bf16.msra.mxu1 %v3570_v2  ;;  %v3597_v29 = vld [vmem:[%s4401_s1 + $0xd0] sm:$0xff]   ;;  %v3599_v31 = vld [vmem:[%s4401_s1 + $0xd8] sm:$0xff]   ;;  %v3600_v32 = vld [vmem:[%s4401_s1 + $0x60] sm:$0xff]   ;;  %s3958_s29 = scalar_lea.vmem %s4400_s0, %s2958_s26 }
  0x11   : > { %3453 = vmatprep.subr.bf16.mxu0 %v3571_v3  ;;  %3530 = vmatprep.subr.bf16.mxu1 %v3571_v3  ;;  %v3601_v33 = vld [vmem:[%s4401_s1 + $0xe0] sm:$0xff]   ;;  %v3602_v34 = vld [vmem:[%s4401_s1 + $0x68] sm:$0xff]   ;;  %v3604_v36 = vld [vmem:[%s4401_s1 + $0x70] sm:$0xff]  }
  0x12   : > { %v3603_v35 = vld [vmem:[%s4401_s1 + $0xe8] sm:$0xff]   ;;  %v3605_v37 = vld [vmem:[%s4401_s1 + $0xf0] sm:$0xff]   ;;  %v3606_v38 = vld [vmem:[%s4401_s1 + $0x78] sm:$0xff]  }
  0x13   : > { %v3607_v39 = vld [vmem:[%s4401_s1 + $0xf8] sm:$0xff]   ;;  %v3610_v40 = vld [vmem:[%s3958_s29 + $0x4] ss:$16 sps:$4 sm:$0xff]  }
  0x14   : > { %3454 = vmatpush3.bf16.msra.mxu0 %v3571_v3  ;;  %3538 = vmatpush3.bf16.msra.mxu1 %v3571_v3  ;;  %v3613_v41 = vld [vmem:[%s3958_s29 + $0xc] ss:$16 sps:$4 sm:$0xff]  }
  0x15   : > { %3455 = vmatprep.subr.bf16.mxu0 %v3572_v6  ;;  %3531 = vmatprep.subr.bf16.mxu1 %v3572_v6 }
  0x18   : > { %3456 = vmatpush3.bf16.msra.mxu0 %v3572_v6  ;;  %3539 = vmatpush3.bf16.msra.mxu1 %v3572_v6 }
  0x19   : > { %3457 = vmatprep.subr.bf16.mxu0 %v3573_v7  ;;  %3532 = vmatprep.subr.bf16.mxu1 %v3573_v7 }
  0x1c   : > { %3458 = vmatpush3.bf16.msra.mxu0 %v3573_v7  ;;  %3540 = vmatpush3.bf16.msra.mxu1 %v3573_v7 }
  0x1d   : > { %3459 = vmatprep.subr.bf16.mxu0 %v3574_v8  ;;  %3533 = vmatprep.subr.bf16.mxu1 %v3574_v8 }
  0x20   : > { %3460 = vmatpush3.bf16.msra.mxu0 %v3574_v8  ;;  %3541 = vmatpush3.bf16.msra.mxu1 %v3574_v8 }
  0x21   : > { %3461 = vmatprep.subr.bf16.mxu0 %v3575_v9  ;;  %3534 = vmatprep.subr.bf16.mxu1 %v3575_v9 }
  0x24   : > { %3462 = vmatpush3.bf16.msra.mxu0 %v3575_v9  ;;  %3542 = vmatpush3.bf16.msra.mxu1 %v3575_v9 }
  0x27   : > { %3464 = vmatmul.mubr.bf16.vlgmr.msra.gmra.mrb[0].mxu0 %v3578_v10  ;;  %3496 = vmatmul.mubr.bf16.vlgmr.msra.gmra.mrb[0].mxu1 %v3579_v11 }
  0x28   : > { %3467 = vmatprep.mubr.bf16.mxu0 %v3580_v12  ;;  %3499 = vmatprep.mubr.bf16.mxu1 %v3581_v13 }
  0x2f   : > { %3468 = vmatmul.mubr.bf16.gmra.mrb[4].mxu0 %v3582_v14  ;;  %3500 = vmatmul.mubr.bf16.gmra.mrb[4].mxu1 %v3583_v15 }
  0x30   : > { %3471 = vmatprep.mubr.bf16.mxu0 %v3584_v16  ;;  %3503 = vmatprep.mubr.bf16.mxu1 %v3585_v17 }
  0x37   : > { %3472 = vmatmul.mubr.bf16.gmra.mrb[8].mxu0 %v3586_v18  ;;  %3504 = vmatmul.mubr.bf16.gmra.mrb[8].mxu1 %v3587_v19 }
  0x38   : > { %3475 = vmatprep.mubr.bf16.mxu0 %v3588_v20  ;;  %3507 = vmatprep.mubr.bf16.mxu1 %v3589_v21 }
  0x3f   : > { %3476 = vmatmul.mubr.bf16.gmra.mrb[12].mxu0 %v3590_v22  ;;  %3508 = vmatmul.mubr.bf16.gmra.mrb[12].mxu1 %v3591_v23 }
  0x40   : > { %3479 = vmatprep.mubr.bf16.mxu0 %v3592_v24  ;;  %3511 = vmatprep.mubr.bf16.mxu1 %v3593_v25 }
  0x47   : > { %3480 = vmatmul.mubr.bf16.gmra.mrb[16].mxu0 %v3594_v26  ;;  %3512 = vmatmul.mubr.bf16.gmra.mrb[16].mxu1 %v3595_v27 }
  0x48   : > { %3483 = vmatprep.mubr.bf16.mxu0 %v3596_v28  ;;  %3515 = vmatprep.mubr.bf16.mxu1 %v3597_v29 }
  0x4f   : > { %3484 = vmatmul.mubr.bf16.gmra.mrb[20].mxu0 %v3598_v30  ;;  %3516 = vmatmul.mubr.bf16.gmra.mrb[20].mxu1 %v3599_v31 }
  0x50   : > { %3487 = vmatprep.mubr.bf16.mxu0 %v3600_v32  ;;  %3519 = vmatprep.mubr.bf16.mxu1 %v3601_v33 }
  0x57   : > { %3488 = vmatmul.mubr.bf16.gmra.mrb[24].mxu0 %v3602_v34  ;;  %3520 = vmatmul.mubr.bf16.gmra.mrb[24].mxu1 %v3603_v35 }
  0x58   : > { %3491 = vmatprep.mubr.bf16.mxu0 %v3604_v36  ;;  %3523 = vmatprep.mubr.bf16.mxu1 %v3605_v37 }
  0x5f   : > { %3492 = vmatmul.mubr.bf16.gmra.mrb[28].mxu0 %v3606_v38  ;;  %3524 = vmatmul.mubr.bf16.gmra.mrb[28].mxu1 %v3607_v39 }
  0x60   : > { %1417 = vmatprep.mubr.bf16.mxu1 %v3610_v40  ;;  %1578 = vmatprep.mubr.bf16.mxu0 %v3613_v41 }
  0xfa   : > { %v3962_v42 = vpop.f32.mrb[0].mxu0  ;;  %v3964_v43 = vpop.f32.mrb[0].mxu1 }
  0xfb   : > { %v682_v44 = vpop.f32.mrb[1].mxu0  ;;  %v810_v45 = vpop.f32.mrb[1].mxu1 }
  0xfc   : > { %v3966_v46 = vpop.f32.mrb[2].mxu0  ;;  %v3968_v47 = vpop.f32.mrb[2].mxu1 }
  0xfd   : > { %v938_v48 = vpack.c.bf16 %v3966_v46, %v3962_v42  ;;  %v954_v49 = vpack.c.bf16 %v3968_v47, %v3964_v43  ;;  %v685_v50 = vpop.f32.mrb[3].mxu0  ;;  %v813_v51 = vpop.f32.mrb[3].mxu1 }
  0xfe   : > { %v937_v52 = vpack.c.bf16 %v685_v50, %v682_v44  ;;  %v953_v53 = vpack.c.bf16 %v813_v51, %v810_v45 }
 0x102   : > { %v3974_v54 = vpop.f32.mrb[4].mxu0  ;;  %v3976_v55 = vpop.f32.mrb[4].mxu1 }
 0x103   : > { %v3978_v56 = vpop.f32.mrb[5].mxu0  ;;  %v3980_v57 = vpop.f32.mrb[5].mxu1 }
 0x104   : > { %v3982_v58 = vpop.f32.mrb[6].mxu0  ;;  %v3984_v59 = vpop.f32.mrb[6].mxu1 }
 0x105   : > { %v940_v60 = vpack.c.bf16 %v3982_v58, %v3974_v54  ;;  %v956_v61 = vpack.c.bf16 %v3984_v59, %v3976_v55  ;;  %v701_v62 = vpop.f32.mrb[7].mxu0  ;;  %v829_v63 = vpop.f32.mrb[7].mxu1 }
 0x106   : > { %v939_v0 = vpack.c.bf16 %v701_v62, %v3978_v56  ;;  %v955_v1 = vpack.c.bf16 %v829_v63, %v3980_v57 }
 0x10a   : > { %v3992_v2 = vpop.f32.mrb[8].mxu0  ;;  %v3994_v3 = vpop.f32.mrb[8].mxu1 }
 0x10b   : > { %v3996_v4 = vpop.f32.mrb[9].mxu0  ;;  %v3998_v5 = vpop.f32.mrb[9].mxu1 }
 0x10c   : > { %v4000_v6 = vpop.f32.mrb[10].mxu0  ;;  %v4002_v7 = vpop.f32.mrb[10].mxu1 }
 0x10d   : > { %v942_v8 = vpack.c.bf16 %v4000_v6, %v3992_v2  ;;  %v958_v9 = vpack.c.bf16 %v4002_v7, %v3994_v3  ;;  %v4008_v10 = vpop.f32.mrb[11].mxu0  ;;  %v4010_v11 = vpop.f32.mrb[11].mxu1  ;;  %v3698_v2 = vld [vmem:[%s4404_s4 + $0x40] sm:$0xff]   ;;  %v3611_v6 = vld [vmem:[%s3958_s29 + $0x8] ss:$16 sps:$4 sm:$0xff]  }
 0x10e   : > { %v941_v12 = vpack.c.bf16 %v4008_v10, %v3996_v4  ;;  %v957_v13 = vpack.c.bf16 %v4010_v11, %v3998_v5  ;;  %v3608_v3 = vld [vmem:[%s3958_s29] ss:$16 sps:$4 sm:$0xff]   ;;  %v3614_v7 = vld [vmem:[%s3958_s29 + $0x24] ss:$16 sps:$4 sm:$0xff]   ;;  %v3706_v10 = vld [vmem:[%s4404_s4 + $0x48] sm:$0xff]  }
 0x10f   : > { %v3707_v11 = vld [vmem:[%s4404_s4 + $0x8] sm:$0xff]  }
 0x112   : > { %v4016_v14 = vpop.f32.mrb[12].mxu0  ;;  %v4018_v15 = vpop.f32.mrb[12].mxu1 }
 0x113   : > { %v4020_v16 = vpop.f32.mrb[13].mxu0  ;;  %v4022_v17 = vpop.f32.mrb[13].mxu1 }
 0x114   : > { %v4024_v18 = vpop.f32.mrb[14].mxu0  ;;  %v4026_v19 = vpop.f32.mrb[14].mxu1 }
 0x115   : > { %v944_v20 = vpack.c.bf16 %v4024_v18, %v4016_v14  ;;  %v960_v21 = vpack.c.bf16 %v4026_v19, %v4018_v15  ;;  %v4032_v22 = vpop.f32.mrb[15].mxu0  ;;  %v4034_v23 = vpop.f32.mrb[15].mxu1  ;;  %v3619_v14 = vld [vmem:[%s3958_s29 + $0x28] ss:$16 sps:$4 sm:$0xff]   ;;  %v3620_v15 = vld [vmem:[%s3958_s29 + $0x44] ss:$16 sps:$4 sm:$0xff]  }
 0x116   : > { %v943_v24 = vpack.c.bf16 %v4032_v22, %v4020_v16  ;;  %v959_v25 = vpack.c.bf16 %v4034_v23, %v4022_v17  ;;  %v3622_v16 = vld [vmem:[%s3958_s29 + $0x4c] ss:$16 sps:$4 sm:$0xff]   ;;  %v3709_v17 = vld [vmem:[%s4404_s4 + $0x10] sm:$0xff]   ;;  %v3625_v22 = vld [vmem:[%s3958_s29 + $0x48] ss:$16 sps:$4 sm:$0xff]  }
 0x117   : > { %v3710_v18 = vld [vmem:[%s4404_s4 + $0x58] sm:$0xff]   ;;  %v3626_v23 = vld [vmem:[%s3958_s29 + $0x64] ss:$16 sps:$4 sm:$0xff]  }
 0x118   : > { %v3711_v19 = vld [vmem:[%s4404_s4 + $0x18] sm:$0xff]  }
 0x11a   : > { %v3481_v26 = vpop.f32.mrb[16].mxu0  ;;  %v3513_v27 = vpop.f32.mrb[16].mxu1 }
 0x11b   : > { %v746_v28 = vpop.f32.mrb[17].mxu0  ;;  %v874_v29 = vpop.f32.mrb[17].mxu1 }
 0x11c   : > { %v3482_v30 = vpop.f32.mrb[18].mxu0  ;;  %v3514_v31 = vpop.f32.mrb[18].mxu1 }
 0x11d   : > { %v946_v32 = vpack.c.bf16 %v3482_v30, %v3481_v26  ;;  %v962_v33 = vpack.c.bf16 %v3514_v31, %v3513_v27  ;;  %v749_v34 = vpop.f32.mrb[19].mxu0  ;;  %v877_v35 = vpop.f32.mrb[19].mxu1 }
 0x11e   : > { %v945_v36 = vpack.c.bf16 %v749_v34, %v746_v28  ;;  %v961_v37 = vpack.c.bf16 %v877_v35, %v874_v29  ;;  %v3630_v34 = vld [vmem:[%s3958_s29 + $0x60] ss:$16 sps:$4 sm:$0xff]   ;;  %v3631_v35 = vld [vmem:[%s3958_s29 + $0x68] ss:$16 sps:$4 sm:$0xff]  }
 0x120   : > { %2999 = vmatprep.subr.bf16.mxu1 %v945_v36  ;;  %3111 = vmatprep.subr.bf16.mxu0 %v961_v37  ;;  %v3632_v36 = vld [vmem:[%s3958_s29 + $0x84] ss:$16 sps:$4 sm:$0xff]   ;;  %v3634_v37 = vld [vmem:[%s3958_s29 + $0x8c] ss:$16 sps:$4 sm:$0xff]  }
 0x121   : > { %3000 = vmatpush3.bf16.msra.mxu1 %v937_v52  ;;  %3112 = vmatpush3.bf16.msra.mxu0 %v953_v53 }
 0x122   : > { %v3485_v38 = vpop.f32.mrb[20].mxu0  ;;  %v3517_v39 = vpop.f32.mrb[20].mxu1  ;;  %3001 = vmatprep.subr.bf16.mxu1 %v946_v32  ;;  %3113 = vmatprep.subr.bf16.mxu0 %v962_v33  ;;  %v3714_v32 = vld [vmem:[%s4404_s4 + $0x68] sm:$0xff]  }
 0x123   : > { %v762_v40 = vpop.f32.mrb[21].mxu0  ;;  %v890_v41 = vpop.f32.mrb[21].mxu1  ;;  %v3715_v33 = vld [vmem:[%s4404_s4 + $0x28] sm:$0xff]  }
 0x124   : > { %v3486_v44 = vpop.f32.mrb[22].mxu0  ;;  %v3518_v45 = vpop.f32.mrb[22].mxu1 }
 0x125   : > { %v948_v50 = vpack.c.bf16 %v3486_v44, %v3485_v38  ;;  %v964_v51 = vpack.c.bf16 %v3518_v45, %v3517_v39  ;;  %v765_v56 = vpop.f32.mrb[23].mxu0  ;;  %v893_v57 = vpop.f32.mrb[23].mxu1  ;;  %3002 = vmatpush3.bf16.msra.mxu1 %v938_v48  ;;  %3114 = vmatpush3.bf16.msra.mxu0 %v954_v49  ;;  %v3636_v38 = vld [vmem:[%s3958_s29 + $0x80] ss:$16 sps:$4 sm:$0xff]   ;;  %v3637_v39 = vld [vmem:[%s3958_s29 + $0x88] ss:$16 sps:$4 sm:$0xff]  }
 0x126   : > { %v947_v52 = vpack.c.bf16 %v765_v56, %v762_v40  ;;  %v963_v53 = vpack.c.bf16 %v893_v57, %v890_v41  ;;  %v3638_v40 = vld [vmem:[%s3958_s29 + $0xa4] ss:$16 sps:$4 sm:$0xff]   ;;  %v3640_v41 = vld [vmem:[%s3958_s29 + $0xac] ss:$16 sps:$4 sm:$0xff]   ;;  %v3642_v44 = vld [vmem:[%s3958_s29 + $0xa0] ss:$16 sps:$4 sm:$0xff]  }
 0x127   : > { %v3643_v45 = vld [vmem:[%s3958_s29 + $0xa8] ss:$16 sps:$4 sm:$0xff]   ;;  %v3648_v56 = vld [vmem:[%s3958_s29 + $0xc0] ss:$16 sps:$4 sm:$0xff]  }
 0x128   : > { %3003 = vmatprep.subr.bf16.mxu1 %v947_v52  ;;  %3115 = vmatprep.subr.bf16.mxu0 %v963_v53  ;;  %v3649_v57 = vld [vmem:[%s3958_s29 + $0xc8] ss:$16 sps:$4 sm:$0xff]   ;;  %v3650_v52 = vld [vmem:[%s3958_s29 + $0xe4] ss:$16 sps:$4 sm:$0xff]   ;;  %v3652_v53 = vld [vmem:[%s3958_s29 + $0xec] ss:$16 sps:$4 sm:$0xff]  }
 0x129   : > { %3004 = vmatpush3.bf16.msra.mxu1 %v939_v0  ;;  %3116 = vmatpush3.bf16.msra.mxu0 %v955_v1 }
 0x12a   : > { %v3489_v62 = vpop.f32.mrb[24].mxu0  ;;  %v3521_v63 = vpop.f32.mrb[24].mxu1  ;;  %3005 = vmatprep.subr.bf16.mxu1 %v948_v50  ;;  %3117 = vmatprep.subr.bf16.mxu0 %v964_v51  ;;  %v3644_v50 = vld [vmem:[%s3958_s29 + $0xc4] ss:$16 sps:$4 sm:$0xff]   ;;  %v3646_v51 = vld [vmem:[%s3958_s29 + $0xcc] ss:$16 sps:$4 sm:$0xff]  }
 0x12b   : > { %v778_v26 = vpop.f32.mrb[25].mxu0  ;;  %v906_v27 = vpop.f32.mrb[25].mxu1 }
 0x12c   : > { %v3490_v28 = vpop.f32.mrb[26].mxu0  ;;  %v3522_v29 = vpop.f32.mrb[26].mxu1 }
 0x12d   : > { %v950_v42 = vpack.c.bf16 %v3490_v28, %v3489_v62  ;;  %v966_v46 = vpack.c.bf16 %v3522_v29, %v3521_v63  ;;  %v781_v48 = vpop.f32.mrb[27].mxu0  ;;  %v909_v30 = vpop.f32.mrb[27].mxu1  ;;  %3006 = vmatpush3.bf16.msra.mxu1 %v940_v60  ;;  %3118 = vmatpush3.bf16.msra.mxu0 %v956_v61  ;;  %v3654_v62 = vld [vmem:[%s3958_s29 + $0xe0] ss:$16 sps:$4 sm:$0xff]   ;;  %v3655_v63 = vld [vmem:[%s3958_s29 + $0xe8] ss:$16 sps:$4 sm:$0xff]  }
 0x12e   : > { %v949_v43 = vpack.c.bf16 %v781_v48, %v778_v26  ;;  %v965_v47 = vpack.c.bf16 %v909_v30, %v906_v27  ;;  %v3656_v26 = vld [vmem:[%s3958_s29 + $0x104] ss:$16 sps:$4 sm:$0xff]   ;;  %v3658_v27 = vld [vmem:[%s3958_s29 + $0x10c] ss:$16 sps:$4 sm:$0xff]   ;;  %v3660_v28 = vld [vmem:[%s3958_s29 + $0x100] ss:$16 sps:$4 sm:$0xff]  }
 0x12f   : > { %v3661_v29 = vld [vmem:[%s3958_s29 + $0x108] ss:$16 sps:$4 sm:$0xff]   ;;  %v3666_v48 = vld [vmem:[%s3958_s29 + $0x120] ss:$16 sps:$4 sm:$0xff]  }
 0x130   : > { %3007 = vmatprep.subr.bf16.mxu1 %v949_v43  ;;  %3119 = vmatprep.subr.bf16.mxu0 %v965_v47  ;;  %v3667_v30 = vld [vmem:[%s3958_s29 + $0x128] ss:$16 sps:$4 sm:$0xff]   ;;  %v3668_v43 = vld [vmem:[%s3958_s29 + $0x144] ss:$16 sps:$4 sm:$0xff]   ;;  %v3670_v47 = vld [vmem:[%s3958_s29 + $0x14c] ss:$16 sps:$4 sm:$0xff]  }
 0x131   : > { %3008 = vmatpush3.bf16.msra.mxu1 %v941_v12  ;;  %3120 = vmatpush3.bf16.msra.mxu0 %v957_v13  ;;  %v3708_v12 = vld [vmem:[%s4404_s4 + $0x50] sm:$0xff]  }
 0x132   : > { %v3493_v49 = vpop.f32.mrb[28].mxu0  ;;  %v3525_v0 = vpop.f32.mrb[28].mxu1  ;;  %3009 = vmatprep.subr.bf16.mxu1 %v950_v42  ;;  %3121 = vmatprep.subr.bf16.mxu0 %v966_v46  ;;  %v3618_v13 = vld [vmem:[%s3958_s29 + $0x20] ss:$16 sps:$4 sm:$0xff]   ;;  %v3662_v42 = vld [vmem:[%s3958_s29 + $0x124] ss:$16 sps:$4 sm:$0xff]  }
 0x133   : > { %v794_v54 = vpop.f32.mrb[29].mxu0  ;;  %v922_v58 = vpop.f32.mrb[29].mxu1  ;;  %v3664_v46 = vld [vmem:[%s3958_s29 + $0x12c] ss:$16 sps:$4 sm:$0xff]  }
 0x134   : > { %v3494_v55 = vpop.f32.mrb[30].mxu0  ;;  %v3526_v59 = vpop.f32.mrb[30].mxu1 }
 0x135   : > { %v952_v60 = vpack.c.bf16 %v3494_v55, %v3493_v49  ;;  %v968_v61 = vpack.c.bf16 %v3526_v59, %v3525_v0  ;;  %v797_v1 = vpop.f32.mrb[31].mxu0  ;;  %v925_v31 = vpop.f32.mrb[31].mxu1  ;;  %3010 = vmatpush3.bf16.msra.mxu1 %v942_v8  ;;  %3122 = vmatpush3.bf16.msra.mxu0 %v958_v9  ;;  %v3616_v8 = vld [vmem:[%s3958_s29 + $0x2c] ss:$16 sps:$4 sm:$0xff]   ;;  %v3699_v9 = vld [vmem:[%s4404_s4] sm:$0xff]   ;;  %v3716_v55 = vld [vmem:[%s4404_s4 + $0x70] sm:$0xff]  }
 0x136   : > { %v951_v4 = vpack.c.bf16 %v797_v1, %v794_v54  ;;  %v967_v5 = vpack.c.bf16 %v925_v31, %v922_v58  ;;  %v3672_v49 = vld [vmem:[%s3958_s29 + $0x140] ss:$16 sps:$4 sm:$0xff]   ;;  %v3673_v0 = vld [vmem:[%s3958_s29 + $0x148] ss:$16 sps:$4 sm:$0xff]   ;;  %v3674_v54 = vld [vmem:[%s3958_s29 + $0x164] ss:$16 sps:$4 sm:$0xff]  }
 0x137   : > { %v3676_v58 = vld [vmem:[%s3958_s29 + $0x16c] ss:$16 sps:$4 sm:$0xff]   ;;  %v3678_v59 = vld [vmem:[%s3958_s29 + $0x160] ss:$16 sps:$4 sm:$0xff]  }
 0x138   : > { %3011 = vmatprep.subr.bf16.mxu1 %v951_v4  ;;  %3123 = vmatprep.subr.bf16.mxu0 %v967_v5  ;;  %v3682_v1 = vld [vmem:[%s3958_s29 + $0x18c] ss:$16 sps:$4 sm:$0xff]   ;;  %v3717_v31 = vld [vmem:[%s4404_s4 + $0x30] sm:$0xff]   ;;  %v3685_v5 = vld [vmem:[%s3958_s29 + $0x188] ss:$16 sps:$4 sm:$0xff]  }
 0x139   : > { %3012 = vmatpush3.bf16.msra.mxu1 %v943_v24  ;;  %3124 = vmatpush3.bf16.msra.mxu0 %v959_v25  ;;  %v3628_v24 = vld [vmem:[%s3958_s29 + $0x6c] ss:$16 sps:$4 sm:$0xff]   ;;  %v3713_v25 = vld [vmem:[%s4404_s4 + $0x20] sm:$0xff]  }
 0x13a   : > { %3013 = vmatprep.subr.bf16.mxu1 %v952_v60  ;;  %3125 = vmatprep.subr.bf16.mxu0 %v968_v61  ;;  %v3679_v60 = vld [vmem:[%s3958_s29 + $0x168] ss:$16 sps:$4 sm:$0xff]   ;;  %v3680_v61 = vld [vmem:[%s3958_s29 + $0x184] ss:$16 sps:$4 sm:$0xff]   ;;  %v3684_v4 = vld [vmem:[%s3958_s29 + $0x180] ss:$16 sps:$4 sm:$0xff]  }
 0x13d   : > { %3014 = vmatpush3.bf16.msra.mxu1 %v944_v20  ;;  %3126 = vmatpush3.bf16.msra.mxu0 %v960_v21  ;;  %v3712_v20 = vld [vmem:[%s4404_s4 + $0x60] sm:$0xff]  }
 0x13e   : > { %3223 = vmatprep.subr.bf16.mxu1 %v3698_v2  ;;  %v3624_v21 = vld [vmem:[%s3958_s29 + $0x40] ss:$16 sps:$4 sm:$0xff]   ;;  %v3686_v2 = vld [vmem:[%s3958_s29 + $0x1a4] ss:$16 sps:$4 sm:$0xff]  }
 0x140   : > { %1418 = vmatmul.mubr.bf16.vlgmr.msra.gmra.mrb[32].mxu1 %v3608_v3  ;;  %1579 = vmatmul.mubr.bf16.vlgmr.msra.gmra.mrb[32].mxu0 %v3611_v6  ;;  %v3688_v3 = vld [vmem:[%s3958_s29 + $0x1ac] ss:$16 sps:$4 sm:$0xff]  }
 0x141   : > { %1425 = vmatprep.mubr.bf16.mxu1 %v3614_v7  ;;  %1586 = vmatprep.mubr.bf16.mxu0 %v3616_v8  ;;  %v3718_v6 = vld [vmem:[%s4404_s4 + $0x78] sm:$0xff]   ;;  %v3690_v8 = vld [vmem:[%s3958_s29 + $0x1a0] ss:$16 sps:$4 sm:$0xff]  }
 0x142   : > { %3224 = vmatpush3.bf16.msra.mxu1 %v3699_v9  ;;  %v3719_v7 = vld [vmem:[%s4404_s4 + $0x38] sm:$0xff]  }
 0x143   : > { %3225 = vmatprep.subr.bf16.mxu1 %v3706_v10  ;;  %v3691_v9 = vld [vmem:[%s3958_s29 + $0x1a8] ss:$16 sps:$4 sm:$0xff]   ;;  %v3692_v10 = vld [vmem:[%s3958_s29 + $0x1c4] ss:$16 sps:$4 sm:$0xff]  }
 0x146   : > { %3226 = vmatpush3.bf16.msra.mxu1 %v3707_v11  ;;  %v3694_v11 = vld [vmem:[%s3958_s29 + $0x1cc] ss:$16 sps:$4 sm:$0xff]  }
 0x147   : > { %3227 = vmatprep.subr.bf16.mxu1 %v3708_v12  ;;  %v3696_v12 = vld [vmem:[%s3958_s29 + $0x1c0] ss:$16 sps:$4 sm:$0xff]  }
 0x148   : > { %1426 = vmatmul.mubr.bf16.gmra.mrb[36].mxu1 %v3618_v13  ;;  %1587 = vmatmul.mubr.bf16.gmra.mrb[36].mxu0 %v3619_v14  ;;  %v3697_v13 = vld [vmem:[%s3958_s29 + $0x1c8] ss:$16 sps:$4 sm:$0xff]   ;;  %v3700_v14 = vld [vmem:[%s3958_s29 + $0x1e4] ss:$16 sps:$4 sm:$0xff]  }
 0x149   : > { %1433 = vmatprep.mubr.bf16.mxu1 %v3620_v15  ;;  %1594 = vmatprep.mubr.bf16.mxu0 %v3622_v16  ;;  %v3702_v15 = vld [vmem:[%s3958_s29 + $0x1ec] ss:$16 sps:$4 sm:$0xff]   ;;  %v3704_v16 = vld [vmem:[%s3958_s29 + $0x1e0] ss:$16 sps:$4 sm:$0xff]  }
 0x14a   : > { %3228 = vmatpush3.bf16.msra.mxu1 %v3709_v17  ;;  %v3705_v17 = vld [vmem:[%s3958_s29 + $0x1e8] ss:$16 sps:$4 sm:$0xff]  }
 0x14b   : > { %3229 = vmatprep.subr.bf16.mxu1 %v3710_v18  ;;  %v3720_v18 = vld [vmem:[%s4180_s21] sm:$0xff]  }
 0x14e   : > { %3230 = vmatpush3.bf16.msra.mxu1 %v3711_v19 }
 0x14f   : > { %3231 = vmatprep.subr.bf16.mxu1 %v3712_v20 }
 0x150   : > { %1434 = vmatmul.mubr.bf16.gmra.mrb[40].mxu1 %v3624_v21  ;;  %1595 = vmatmul.mubr.bf16.gmra.mrb[40].mxu0 %v3625_v22  ;;  %v3733_v21 = vld [vmem:[%s4405_s5 + $0x40] sm:$0xff]  }
 0x151   : > { %1441 = vmatprep.mubr.bf16.mxu1 %v3626_v23  ;;  %1602 = vmatprep.mubr.bf16.mxu0 %v3628_v24  ;;  %v3734_v22 = vld [vmem:[%s4405_s5] sm:$0xff]   ;;  %v3737_v23 = vld [vmem:[%s4405_s5 + $0x48] sm:$0xff]  }
 0x152   : > { %3232 = vmatpush3.bf16.msra.mxu1 %v3713_v25  ;;  %3335 = vmatprep.subr.bf16.mxu0 %v3733_v21 }
 0x153   : > { %3233 = vmatprep.subr.bf16.mxu1 %v3714_v32  ;;  %3336 = vmatpush3.bf16.msra.mxu0 %v3734_v22 }
 0x154   : > { %3337 = vmatprep.subr.bf16.mxu0 %v3737_v23  ;;  %v3749_v23 = vld [vmem:[%s4405_s5 + $0x30] sm:$0xff]  }
 0x156   : > { %3234 = vmatpush3.bf16.msra.mxu1 %v3715_v33 }
 0x157   : > { %3235 = vmatprep.subr.bf16.mxu1 %v3716_v55  ;;  %v4228_v55 = vld [vmem:[%s4180_s21 + $0x8] sm:$0xff]  }
 0x158   : > { %1442 = vmatmul.mubr.bf16.gmra.mrb[44].mxu1 %v3630_v34  ;;  %1603 = vmatmul.mubr.bf16.gmra.mrb[44].mxu0 %v3631_v35 }
 0x159   : > { %1449 = vmatprep.mubr.bf16.mxu1 %v3632_v36  ;;  %1610 = vmatprep.mubr.bf16.mxu0 %v3634_v37 }
 0x15a   : > { %3236 = vmatpush3.bf16.msra.mxu1 %v3717_v31 }
 0x15b   : > { %3237 = vmatprep.subr.bf16.mxu1 %v3718_v6 }
 0x15e   : > { %3238 = vmatpush3.bf16.msra.mxu1 %v3719_v7 }
 0x160   : > { %1450 = vmatmul.mubr.bf16.gmra.mrb[48].mxu1 %v3636_v38  ;;  %1611 = vmatmul.mubr.bf16.gmra.mrb[48].mxu0 %v3637_v39  ;;  %v3738_v38 = vld [vmem:[%s4405_s5 + $0x8] sm:$0xff]  }
 0x161   : > { %1457 = vmatprep.mubr.bf16.mxu1 %v3638_v40  ;;  %1618 = vmatprep.mubr.bf16.mxu0 %v3640_v41 }
 0x162   : > { %3338 = vmatpush3.bf16.msra.mxu0 %v3738_v38 }
 0x168   : > { %1458 = vmatmul.mubr.bf16.gmra.mrb[52].mxu1 %v3642_v44  ;;  %1619 = vmatmul.mubr.bf16.gmra.mrb[52].mxu0 %v3643_v45  ;;  %v4208_v44 = vld [vmem:[%s4403_s3] ss:$0 sm:$0xff] }
 0x169   : > { %1465 = vmatprep.mubr.bf16.mxu1 %v3644_v50  ;;  %1626 = vmatprep.mubr.bf16.mxu0 %v3646_v51 }
 0x170   : > { %1466 = vmatmul.mubr.bf16.gmra.mrb[56].mxu1 %v3648_v56  ;;  %1627 = vmatmul.mubr.bf16.gmra.mrb[56].mxu0 %v3649_v57  ;;  %v3740_v57 = vld [vmem:[%s4405_s5 + $0x50] sm:$0xff]  }
 0x171   : > { %1473 = vmatprep.mubr.bf16.mxu1 %v3650_v52  ;;  %1634 = vmatprep.mubr.bf16.mxu0 %v3652_v53  ;;  %v3741_v52 = vld [vmem:[%s4405_s5 + $0x10] sm:$0xff]   ;;  %v3742_v53 = vld [vmem:[%s4405_s5 + $0x58] sm:$0xff]  }
 0x172   : > { %3339 = vmatprep.subr.bf16.mxu0 %v3740_v57 }
 0x173   : > { %3340 = vmatpush3.bf16.msra.mxu0 %v3741_v52  ;;  %v4255_v52 = vld [vmem:[%s4180_s21 + $0x18] sm:$0xff]  }
 0x174   : > { %3341 = vmatprep.subr.bf16.mxu0 %v3742_v53 }
 0x178   : > { %1474 = vmatmul.mubr.bf16.gmra.mrb[60].mxu1 %v3654_v62  ;;  %1635 = vmatmul.mubr.bf16.gmra.mrb[60].mxu0 %v3655_v63 }
 0x179   : > { %1481 = vmatprep.mubr.bf16.mxu1 %v3656_v26  ;;  %1642 = vmatprep.mubr.bf16.mxu0 %v3658_v27 }
 0x180   : > { %1482 = vmatmul.mubr.bf16.gmra.mrb[64].mxu1 %v3660_v28  ;;  %1643 = vmatmul.mubr.bf16.gmra.mrb[64].mxu0 %v3661_v29 }
 0x181   : > { %1489 = vmatprep.mubr.bf16.mxu1 %v3662_v42  ;;  %1650 = vmatprep.mubr.bf16.mxu0 %v3664_v46 }
 0x188   : > { %1490 = vmatmul.mubr.bf16.gmra.mrb[68].mxu1 %v3666_v48  ;;  %1651 = vmatmul.mubr.bf16.gmra.mrb[68].mxu0 %v3667_v30 }
 0x189   : > { %1497 = vmatprep.mubr.bf16.mxu1 %v3668_v43  ;;  %1658 = vmatprep.mubr.bf16.mxu0 %v3670_v47  ;;  %v3743_v43 = vld [vmem:[%s4405_s5 + $0x18] sm:$0xff]  }
 0x18a   : > { %3342 = vmatpush3.bf16.msra.mxu0 %v3743_v43 }
 0x190   : > { %1498 = vmatmul.mubr.bf16.gmra.mrb[72].mxu1 %v3672_v49  ;;  %1659 = vmatmul.mubr.bf16.gmra.mrb[72].mxu0 %v3673_v0 }
 0x191   : > { %1505 = vmatprep.mubr.bf16.mxu1 %v3674_v54  ;;  %1666 = vmatprep.mubr.bf16.mxu0 %v3676_v58  ;;  %v3744_v58 = vld [vmem:[%s4405_s5 + $0x60] sm:$0xff]  }
 0x192   : > { %3343 = vmatprep.subr.bf16.mxu0 %v3744_v58 }
 0x198   : > { %1506 = vmatmul.mubr.bf16.gmra.mrb[76].mxu1 %v3678_v59  ;;  %1667 = vmatmul.mubr.bf16.gmra.mrb[76].mxu0 %v3679_v60 }
 0x199   : > { %1513 = vmatprep.mubr.bf16.mxu1 %v3680_v61  ;;  %1674 = vmatprep.mubr.bf16.mxu0 %v3682_v1  ;;  %v3745_v61 = vld [vmem:[%s4405_s5 + $0x20] sm:$0xff]  }
 0x19a   : > { %3344 = vmatpush3.bf16.msra.mxu0 %v3745_v61  ;;  %v4261_v61 = vld [vmem:[%s4180_s21 + $0x20] sm:$0xff]  }
 0x1a0   : > { %1514 = vmatmul.mubr.bf16.gmra.mrb[80].mxu1 %v3684_v4  ;;  %1675 = vmatmul.mubr.bf16.gmra.mrb[80].mxu0 %v3685_v5  ;;  %v3746_v5 = vld [vmem:[%s4405_s5 + $0x68] sm:$0xff]  }
 0x1a1   : > { %1521 = vmatprep.mubr.bf16.mxu1 %v3686_v2  ;;  %1682 = vmatprep.mubr.bf16.mxu0 %v3688_v3 }
 0x1a2   : > { %3345 = vmatprep.subr.bf16.mxu0 %v3746_v5 }
 0x1a8   : > { %1522 = vmatmul.mubr.bf16.gmra.mrb[84].mxu1 %v3690_v8  ;;  %1683 = vmatmul.mubr.bf16.gmra.mrb[84].mxu0 %v3691_v9 }
 0x1a9   : > { %1529 = vmatprep.mubr.bf16.mxu1 %v3692_v10  ;;  %1690 = vmatprep.mubr.bf16.mxu0 %v3694_v11 }
 0x1b0   : > { %1530 = vmatmul.mubr.bf16.gmra.mrb[88].mxu1 %v3696_v12  ;;  %1691 = vmatmul.mubr.bf16.gmra.mrb[88].mxu0 %v3697_v13 }
 0x1b1   : > { %1537 = vmatprep.mubr.bf16.mxu1 %v3700_v14  ;;  %1698 = vmatprep.mubr.bf16.mxu0 %v3702_v15  ;;  %v3747_v14 = vld [vmem:[%s4405_s5 + $0x28] sm:$0xff]  }
 0x1b2   : > { %3346 = vmatpush3.bf16.msra.mxu0 %v3747_v14 }
 0x1b8   : > { %1538 = vmatmul.mubr.bf16.gmra.mrb[92].mxu1 %v3704_v16  ;;  %1699 = vmatmul.mubr.bf16.gmra.mrb[92].mxu0 %v3705_v17 }
 0x1b9   : > { %2186 = vmatprep.mubr.bf16.mxu1 %v3720_v18  ;;  %2523 = vmatprep.mubr.bf16.mxu0 %v3720_v18 }
 0x213   : > { %v3015_v19 = vpop.f32.mrb[32].mxu1  ;;  %v3127_v20 = vpop.f32.mrb[32].mxu0 }
 0x214   : > { %v3016_v24 = vpop.f32.mrb[33].mxu1  ;;  %v3128_v25 = vpop.f32.mrb[33].mxu0 }
 0x215   : > { %v3017_v32 = vadd.f32 %v3016_v24, %v3015_v19  ;;  %v3129_v33 = vadd.f32 %v3128_v25, %v3127_v20  ;;  %v3018_v34 = vpop.f32.mrb[34].mxu1  ;;  %v3130_v35 = vpop.f32.mrb[34].mxu0  ;;  %v3748_v19 = vld [vmem:[%s4405_s5 + $0x70] sm:$0xff]  }
 0x216   : > { %v3019_v36 = vpop.f32.mrb[35].mxu1  ;;  %v3131_v37 = vpop.f32.mrb[35].mxu0  ;;  %v4246_v20 = vld [vmem:[%s4180_s21 + $0x10] sm:$0xff]   ;;  %3347 = vmatprep.subr.bf16.mxu0 %v3748_v19  ;;  %v4267_v19 = vld [vmem:[%s4180_s21 + $0x28] sm:$0xff]  }
 0x217   : > { %v1581_v39 = vadd.f32 %v3129_v33, %v3017_v32  ;;  %v3020_v40 = vadd.f32 %v3019_v36, %v3018_v34  ;;  %v3132_v41 = vadd.f32 %v3131_v37, %v3130_v35  ;;  %3348 = vmatpush3.bf16.msra.mxu0 %v3749_v23 }
 0x219   : > { %v1584_v45 = vadd.f32 %v3132_v41, %v3020_v40  ;;  %v1850_v56 = vadd.f32 %v4208_v44, %v1581_v39 }
 0x21b   : > { %v3021_v50 = vpop.f32.mrb[36].mxu1  ;;  %v3133_v51 = vpop.f32.mrb[36].mxu0  ;;  %v1851_v42 = vadd.f32 %v4208_v44, %v1584_v45  ;;  %v1882_v30 = vmax.f32 %v1850_v56, 0.0 }
 0x21c   : > { %v3022_v62 = vpop.f32.mrb[37].mxu1  ;;  %v3134_v63 = vpop.f32.mrb[37].mxu0 }
 0x21d   : > { %v3023_v26 = vadd.f32 %v3022_v62, %v3021_v50  ;;  %v3135_v27 = vadd.f32 %v3134_v63, %v3133_v51  ;;  %v3024_v28 = vpop.f32.mrb[38].mxu1  ;;  %v3136_v29 = vpop.f32.mrb[38].mxu0  ;;  %v1883_v54 = vmax.f32 %v1851_v42, 0.0 }
 0x21e   : > { %v3025_v46 = vpop.f32.mrb[39].mxu1  ;;  %v3137_v48 = vpop.f32.mrb[39].mxu0 }
 0x21f   : > { %v1589_v47 = vadd.f32 %v3135_v27, %v3023_v26  ;;  %v3026_v49 = vadd.f32 %v3025_v46, %v3024_v28  ;;  %v3138_v0 = vadd.f32 %v3137_v48, %v3136_v29  ;;  %v1914_v60 = vpack.c.bf16 %v1883_v54, %v1882_v30 }
 0x221   : > { %v1592_v59 = vadd.f32 %v3138_v0, %v3026_v49  ;;  %2187 = vmatmul.mubr.bf16.vlgmr.msra.gmra.mrb[96].mxu1 %v1914_v60  ;;  %v1852_v4 = vadd.f32 %v4208_v44, %v1589_v47 }
 0x222   : > { %2194 = vmatprep.mubr.bf16.mxu1 %v4228_v55 }
 0x223   : > { %v3027_v1 = vpop.f32.mrb[40].mxu1  ;;  %v3139_v31 = vpop.f32.mrb[40].mxu0  ;;  %v1853_v10 = vadd.f32 %v4208_v44, %v1592_v59  ;;  %v1884_v13 = vmax.f32 %v1852_v4, 0.0 }
 0x224   : > { %v3028_v2 = vpop.f32.mrb[41].mxu1  ;;  %v3140_v3 = vpop.f32.mrb[41].mxu0 }
 0x225   : > { %v3029_v6 = vadd.f32 %v3028_v2, %v3027_v1  ;;  %v3141_v7 = vadd.f32 %v3140_v3, %v3139_v31  ;;  %v3030_v8 = vpop.f32.mrb[42].mxu1  ;;  %v3142_v9 = vpop.f32.mrb[42].mxu0  ;;  %v1885_v18 = vmax.f32 %v1853_v10, 0.0 }
 0x226   : > { %v3031_v11 = vpop.f32.mrb[43].mxu1  ;;  %v3143_v12 = vpop.f32.mrb[43].mxu0 }
 0x227   : > { %v1597_v15 = vadd.f32 %v3141_v7, %v3029_v6  ;;  %v3032_v16 = vadd.f32 %v3031_v11, %v3030_v8  ;;  %v3144_v17 = vadd.f32 %v3143_v12, %v3142_v9  ;;  %v1915_v22 = vpack.c.bf16 %v1885_v18, %v1884_v13 }
 0x229   : > { %v1600_v21 = vadd.f32 %v3144_v17, %v3032_v16  ;;  %2195 = vmatmul.mubr.bf16.gmra.mrb[100].mxu1 %v1915_v22  ;;  %v1854_v32 = vadd.f32 %v4208_v44, %v1597_v15 }
 0x22a   : > { %2202 = vmatprep.mubr.bf16.mxu1 %v4246_v20 }
 0x22b   : > { %v3033_v24 = vpop.f32.mrb[44].mxu1  ;;  %v3145_v25 = vpop.f32.mrb[44].mxu0  ;;  %v1855_v39 = vadd.f32 %v4208_v44, %v1600_v21  ;;  %v1886_v45 = vmax.f32 %v1854_v32, 0.0 }
 0x22c   : > { %v3034_v33 = vpop.f32.mrb[45].mxu1  ;;  %v3146_v34 = vpop.f32.mrb[45].mxu0 }
 0x22d   : > { %v3035_v35 = vadd.f32 %v3034_v33, %v3033_v24  ;;  %v3147_v36 = vadd.f32 %v3146_v34, %v3145_v25  ;;  %v3036_v37 = vpop.f32.mrb[46].mxu1  ;;  %v3148_v38 = vpop.f32.mrb[46].mxu0  ;;  %v1887_v57 = vmax.f32 %v1855_v39, 0.0 }
 0x22e   : > { %v3037_v40 = vpop.f32.mrb[47].mxu1  ;;  %v3149_v41 = vpop.f32.mrb[47].mxu0 }
 0x22f   : > { %v1605_v50 = vadd.f32 %v3147_v36, %v3035_v35  ;;  %v3038_v51 = vadd.f32 %v3037_v40, %v3036_v37  ;;  %v3150_v56 = vadd.f32 %v3149_v41, %v3148_v38  ;;  %v1916_v62 = vpack.c.bf16 %v1887_v57, %v1886_v45  ;;  %v4273_v57 = vld [vmem:[%s4180_s21 + $0x30] sm:$0xff]  }
 0x231   : > { %v1608_v53 = vadd.f32 %v3150_v56, %v3038_v51  ;;  %2203 = vmatmul.mubr.bf16.gmra.mrb[104].mxu1 %v1916_v62  ;;  %v1856_v27 = vadd.f32 %v4208_v44, %v1605_v50 }
 0x232   : > { %2210 = vmatprep.mubr.bf16.mxu1 %v4255_v52 }
 0x233   : > { %v3039_v63 = vpop.f32.mrb[48].mxu1  ;;  %v3151_v26 = vpop.f32.mrb[48].mxu0  ;;  %v1857_v43 = vadd.f32 %v4208_v44, %v1608_v53  ;;  %v1888_v0 = vmax.f32 %v1856_v27, 0.0 }
 0x234   : > { %v3040_v28 = vpop.f32.mrb[49].mxu1  ;;  %v3152_v29 = vpop.f32.mrb[49].mxu0 }
 0x235   : > { %v3041_v42 = vadd.f32 %v3040_v28, %v3039_v63  ;;  %v3153_v46 = vadd.f32 %v3152_v29, %v3151_v26  ;;  %v3042_v48 = vpop.f32.mrb[50].mxu1  ;;  %v3154_v30 = vpop.f32.mrb[50].mxu0  ;;  %v1889_v60 = vmax.f32 %v1857_v43, 0.0 }
 0x236   : > { %v3043_v47 = vpop.f32.mrb[51].mxu1  ;;  %v3155_v49 = vpop.f32.mrb[51].mxu0 }
 0x237   : > { %v1613_v54 = vadd.f32 %v3153_v46, %v3041_v42  ;;  %v3044_v58 = vadd.f32 %v3043_v47, %v3042_v48  ;;  %v3156_v59 = vadd.f32 %v3155_v49, %v3154_v30  ;;  %v1917_v31 = vpack.c.bf16 %v1889_v60, %v1888_v0 }
 0x239   : > { %v1616_v1 = vadd.f32 %v3156_v59, %v3044_v58  ;;  %2211 = vmatmul.mubr.bf16.gmra.mrb[108].mxu1 %v1917_v31  ;;  %v1858_v2 = vadd.f32 %v4208_v44, %v1613_v54 }
 0x23a   : > { %2218 = vmatprep.mubr.bf16.mxu1 %v4261_v61 }
 0x23b   : > { %v3045_v4 = vpop.f32.mrb[52].mxu1  ;;  %v3157_v5 = vpop.f32.mrb[52].mxu0  ;;  %v1859_v11 = vadd.f32 %v4208_v44, %v1616_v1  ;;  %v1890_v14 = vmax.f32 %v1858_v2, 0.0  ;;  %v4279_v1 = vld [vmem:[%s4180_s21 + $0x38] sm:$0xff]  }
 0x23c   : > { %v3046_v3 = vpop.f32.mrb[53].mxu1  ;;  %v3158_v6 = vpop.f32.mrb[53].mxu0 }
 0x23d   : > { %v3047_v7 = vadd.f32 %v3046_v3, %v3045_v4  ;;  %v3159_v8 = vadd.f32 %v3158_v6, %v3157_v5  ;;  %v3048_v9 = vpop.f32.mrb[54].mxu1  ;;  %v3160_v10 = vpop.f32.mrb[54].mxu0  ;;  %v1891_v18 = vmax.f32 %v1859_v11, 0.0 }
 0x23e   : > { %v3049_v12 = vpop.f32.mrb[55].mxu1  ;;  %v3161_v13 = vpop.f32.mrb[55].mxu0 }
 0x23f   : > { %v1621_v15 = vadd.f32 %v3159_v8, %v3047_v7  ;;  %v3050_v16 = vadd.f32 %v3049_v12, %v3048_v9  ;;  %v3162_v17 = vadd.f32 %v3161_v13, %v3160_v10  ;;  %v1918_v22 = vpack.c.bf16 %v1891_v18, %v1890_v14 }
 0x241   : > { %v1624_v21 = vadd.f32 %v3162_v17, %v3050_v16  ;;  %2219 = vmatmul.mubr.bf16.gmra.mrb[112].mxu1 %v1918_v22  ;;  %v1860_v25 = vadd.f32 %v4208_v44, %v1621_v15  ;;  %v4285_v22 = vld [vmem:[%s4180_s21 + $0x40] sm:$0xff]  }
 0x242   : > { %2226 = vmatprep.mubr.bf16.mxu1 %v4267_v19 }
 0x243   : > { %v3051_v23 = vpop.f32.mrb[56].mxu1  ;;  %v3163_v24 = vpop.f32.mrb[56].mxu0  ;;  %v1861_v38 = vadd.f32 %v4208_v44, %v1624_v21  ;;  %v1892_v41 = vmax.f32 %v1860_v25, 0.0 }
 0x244   : > { %v3052_v32 = vpop.f32.mrb[57].mxu1  ;;  %v3164_v33 = vpop.f32.mrb[57].mxu0 }
 0x245   : > { %v3053_v34 = vadd.f32 %v3052_v32, %v3051_v23  ;;  %v3165_v35 = vadd.f32 %v3164_v33, %v3163_v24  ;;  %v3054_v36 = vpop.f32.mrb[58].mxu1  ;;  %v3166_v37 = vpop.f32.mrb[58].mxu0  ;;  %v1893_v56 = vmax.f32 %v1861_v38, 0.0 }
 0x246   : > { %v3055_v39 = vpop.f32.mrb[59].mxu1  ;;  %v3167_v40 = vpop.f32.mrb[59].mxu0 }
 0x247   : > { %v1629_v45 = vadd.f32 %v3165_v35, %v3053_v34  ;;  %v3056_v50 = vadd.f32 %v3055_v39, %v3054_v36  ;;  %v3168_v51 = vadd.f32 %v3167_v40, %v3166_v37  ;;  %v1919_v62 = vpack.c.bf16 %v1893_v56, %v1892_v41 }
 0x249   : > { %v1632_v53 = vadd.f32 %v3168_v51, %v3056_v50  ;;  %2227 = vmatmul.mubr.bf16.gmra.mrb[116].mxu1 %v1919_v62  ;;  %v1862_v27 = vadd.f32 %v4208_v44, %v1629_v45 }
 0x24a   : > { %2234 = vmatprep.mubr.bf16.mxu1 %v4273_v57 }
 0x24b   : > { %v3057_v63 = vpop.f32.mrb[60].mxu1  ;;  %v3169_v26 = vpop.f32.mrb[60].mxu0  ;;  %v1863_v43 = vadd.f32 %v4208_v44, %v1632_v53  ;;  %v1894_v0 = vmax.f32 %v1862_v27, 0.0 }
 0x24c   : > { %v3058_v28 = vpop.f32.mrb[61].mxu1  ;;  %v3170_v29 = vpop.f32.mrb[61].mxu0 }
 0x24d   : > { %v3059_v42 = vadd.f32 %v3058_v28, %v3057_v63  ;;  %v3171_v46 = vadd.f32 %v3170_v29, %v3169_v26  ;;  %v3060_v48 = vpop.f32.mrb[62].mxu1  ;;  %v3172_v30 = vpop.f32.mrb[62].mxu0  ;;  %v1895_v60 = vmax.f32 %v1863_v43, 0.0  ;;  %v4291_v63 = vld [vmem:[%s4180_s21 + $0x48] sm:$0xff]  }
 0x24e   : > { %v3061_v47 = vpop.f32.mrb[63].mxu1  ;;  %v3173_v49 = vpop.f32.mrb[63].mxu0 }
 0x24f   : > { %v1637_v54 = vadd.f32 %v3171_v46, %v3059_v42  ;;  %v3062_v58 = vadd.f32 %v3061_v47, %v3060_v48  ;;  %v3174_v59 = vadd.f32 %v3173_v49, %v3172_v30  ;;  %v1920_v4 = vpack.c.bf16 %v1895_v60, %v1894_v0 }
 0x251   : > { %v1640_v31 = vadd.f32 %v3174_v59, %v3062_v58  ;;  %2235 = vmatmul.mubr.bf16.gmra.mrb[120].mxu1 %v1920_v4  ;;  %v1864_v3 = vadd.f32 %v4208_v44, %v1637_v54 }
 0x252   : > { %2242 = vmatprep.mubr.bf16.mxu1 %v4279_v1 }
 0x253   : > { %v3063_v5 = vpop.f32.mrb[64].mxu1  ;;  %v3175_v2 = vpop.f32.mrb[64].mxu0  ;;  %v1865_v12 = vadd.f32 %v4208_v44, %v1640_v31  ;;  %v1896_v15 = vmax.f32 %v1864_v3, 0.0 }
 0x254   : > { %v3064_v6 = vpop.f32.mrb[65].mxu1  ;;  %v3176_v7 = vpop.f32.mrb[65].mxu0 }
 0x255   : > { %v3065_v8 = vadd.f32 %v3064_v6, %v3063_v5  ;;  %v3177_v9 = vadd.f32 %v3176_v7, %v3175_v2  ;;  %v3066_v10 = vpop.f32.mrb[66].mxu1  ;;  %v3178_v11 = vpop.f32.mrb[66].mxu0  ;;  %v1897_v21 = vmax.f32 %v1865_v12, 0.0  ;;  %v4297_v2 = vld [vmem:[%s4180_s21 + $0x50] sm:$0xff]  }
 0x256   : > { %v3067_v13 = vpop.f32.mrb[67].mxu1  ;;  %v3179_v14 = vpop.f32.mrb[67].mxu0 }
 0x257   : > { %v1645_v16 = vadd.f32 %v3177_v9, %v3065_v8  ;;  %v3068_v17 = vadd.f32 %v3067_v13, %v3066_v10  ;;  %v3180_v18 = vadd.f32 %v3179_v14, %v3178_v11  ;;  %v1921_v24 = vpack.c.bf16 %v1897_v21, %v1896_v15 }
 0x259   : > { %v1648_v23 = vadd.f32 %v3180_v18, %v3068_v17  ;;  %2243 = vmatmul.mubr.bf16.gmra.mrb[124].mxu1 %v1921_v24  ;;  %v1866_v33 = vadd.f32 %v4208_v44, %v1645_v16 }
 0x25a   : > { %2250 = vmatprep.mubr.bf16.mxu1 %v4285_v22 }
 0x25b   : > { %v3069_v25 = vpop.f32.mrb[68].mxu1  ;;  %v3181_v32 = vpop.f32.mrb[68].mxu0  ;;  %v1867_v40 = vadd.f32 %v4208_v44, %v1648_v23  ;;  %v1898_v50 = vmax.f32 %v1866_v33, 0.0  ;;  %v4303_v33 = vld [vmem:[%s4180_s21 + $0x58] sm:$0xff]  }
 0x25c   : > { %v3070_v34 = vpop.f32.mrb[69].mxu1  ;;  %v3182_v35 = vpop.f32.mrb[69].mxu0 }
 0x25d   : > { %v3071_v36 = vadd.f32 %v3070_v34, %v3069_v25  ;;  %v3183_v37 = vadd.f32 %v3182_v35, %v3181_v32  ;;  %v3072_v38 = vpop.f32.mrb[70].mxu1  ;;  %v3184_v39 = vpop.f32.mrb[70].mxu0  ;;  %v1899_v62 = vmax.f32 %v1867_v40, 0.0 }
 0x25e   : > { %v3073_v41 = vpop.f32.mrb[71].mxu1  ;;  %v3185_v45 = vpop.f32.mrb[71].mxu0 }
 0x25f   : > { %v1653_v51 = vadd.f32 %v3183_v37, %v3071_v36  ;;  %v3074_v56 = vadd.f32 %v3073_v41, %v3072_v38  ;;  %v3186_v53 = vadd.f32 %v3185_v45, %v3184_v39  ;;  %v1922_v27 = vpack.c.bf16 %v1899_v62, %v1898_v50 }
 0x261   : > { %v1656_v26 = vadd.f32 %v3186_v53, %v3074_v56  ;;  %2251 = vmatmul.mubr.bf16.gmra.mrb[128].mxu1 %v1922_v27  ;;  %v1868_v42 = vadd.f32 %v4208_v44, %v1653_v51 }
 0x262   : > { %2258 = vmatprep.mubr.bf16.mxu1 %v4291_v63 }
 0x263   : > { %v3075_v28 = vpop.f32.mrb[72].mxu1  ;;  %v3187_v29 = vpop.f32.mrb[72].mxu0  ;;  %v1869_v0 = vadd.f32 %v4208_v44, %v1656_v26  ;;  %v1900_v59 = vmax.f32 %v1868_v42, 0.0 }
 0x264   : > { %v3076_v46 = vpop.f32.mrb[73].mxu1  ;;  %v3188_v48 = vpop.f32.mrb[73].mxu0 }
 0x265   : > { %v3077_v30 = vadd.f32 %v3076_v46, %v3075_v28  ;;  %v3189_v43 = vadd.f32 %v3188_v48, %v3187_v29  ;;  %v3078_v47 = vpop.f32.mrb[74].mxu1  ;;  %v3190_v49 = vpop.f32.mrb[74].mxu0  ;;  %v1901_v5 = vmax.f32 %v1869_v0, 0.0  ;;  %v4309_v46 = vld [vmem:[%s4180_s21 + $0x60] sm:$0xff]  }
 0x266   : > { %v3079_v54 = vpop.f32.mrb[75].mxu1  ;;  %v3191_v58 = vpop.f32.mrb[75].mxu0 }
 0x267   : > { %v1661_v60 = vadd.f32 %v3189_v43, %v3077_v30  ;;  %v3080_v31 = vadd.f32 %v3079_v54, %v3078_v47  ;;  %v3192_v4 = vadd.f32 %v3191_v58, %v3190_v49  ;;  %v1923_v6 = vpack.c.bf16 %v1901_v5, %v1900_v59  ;;  %v3750_v43 = vld [vmem:[%s4405_s5 + $0x78] sm:$0xff]  }
 0x268   : > { %v3751_v54 = vld [vmem:[%s4405_s5 + $0x38] sm:$0xff]   ;;  %3349 = vmatprep.subr.bf16.mxu0 %v3750_v43 }
 0x269   : > { %v1664_v3 = vadd.f32 %v3192_v4, %v3080_v31  ;;  %2259 = vmatmul.mubr.bf16.gmra.mrb[132].mxu1 %v1923_v6  ;;  %v1870_v9 = vadd.f32 %v4208_v44, %v1661_v60  ;;  %3350 = vmatpush3.bf16.msra.mxu0 %v3751_v54 }
 0x26a   : > { %2266 = vmatprep.mubr.bf16.mxu1 %v4297_v2 }
 0x26b   : > { %v3081_v7 = vpop.f32.mrb[76].mxu1  ;;  %v3193_v8 = vpop.f32.mrb[76].mxu0  ;;  %v1871_v16 = vadd.f32 %v4208_v44, %v1664_v3  ;;  %v1902_v21 = vmax.f32 %v1870_v9, 0.0 }
 0x26c   : > { %v3082_v10 = vpop.f32.mrb[77].mxu1  ;;  %v3194_v11 = vpop.f32.mrb[77].mxu0 }
 0x26d   : > { %v3083_v12 = vadd.f32 %v3082_v10, %v3081_v7  ;;  %v3195_v13 = vadd.f32 %v3194_v11, %v3193_v8  ;;  %v3084_v14 = vpop.f32.mrb[78].mxu1  ;;  %v3196_v15 = vpop.f32.mrb[78].mxu0  ;;  %v1903_v32 = vmax.f32 %v1871_v16, 0.0 }
 0x26e   : > { %v3085_v17 = vpop.f32.mrb[79].mxu1  ;;  %v3197_v18 = vpop.f32.mrb[79].mxu0 }
 0x26f   : > { %v1669_v23 = vadd.f32 %v3195_v13, %v3083_v12  ;;  %v3086_v24 = vadd.f32 %v3085_v17, %v3084_v14  ;;  %v3198_v25 = vadd.f32 %v3197_v18, %v3196_v15  ;;  %v1924_v35 = vpack.c.bf16 %v1903_v32, %v1902_v21  ;;  %v4321_v13 = vld [vmem:[%s4180_s21 + $0x68] sm:$0xff]  }
 0x271   : > { %v1672_v34 = vadd.f32 %v3198_v25, %v3086_v24  ;;  %2267 = vmatmul.mubr.bf16.gmra.mrb[136].mxu1 %v1924_v35  ;;  %v1872_v38 = vadd.f32 %v4208_v44, %v1669_v23 }
 0x272   : > { %2274 = vmatprep.mubr.bf16.mxu1 %v4303_v33 }
 0x273   : > { %v3087_v36 = vpop.f32.mrb[80].mxu1  ;;  %v3199_v37 = vpop.f32.mrb[80].mxu0  ;;  %v1873_v56 = vadd.f32 %v4208_v44, %v1672_v34  ;;  %v1904_v26 = vmax.f32 %v1872_v38, 0.0 }
 0x274   : > { %v3088_v39 = vpop.f32.mrb[81].mxu1  ;;  %v3200_v40 = vpop.f32.mrb[81].mxu0 }
 0x275   : > { %v3089_v41 = vadd.f32 %v3088_v39, %v3087_v36  ;;  %v3201_v45 = vadd.f32 %v3200_v40, %v3199_v37  ;;  %v3090_v50 = vpop.f32.mrb[82].mxu1  ;;  %v3202_v51 = vpop.f32.mrb[82].mxu0  ;;  %v1905_v42 = vmax.f32 %v1873_v56, 0.0 }
 0x276   : > { %v3091_v53 = vpop.f32.mrb[83].mxu1  ;;  %v3203_v62 = vpop.f32.mrb[83].mxu0 }
 0x277   : > { %v1677_v27 = vadd.f32 %v3201_v45, %v3089_v41  ;;  %v3092_v28 = vadd.f32 %v3091_v53, %v3090_v50  ;;  %v3204_v29 = vadd.f32 %v3203_v62, %v3202_v51  ;;  %v1925_v30 = vpack.c.bf16 %v1905_v42, %v1904_v26  ;;  %v4327_v50 = vld [vmem:[%s4180_s21 + $0x70] sm:$0xff]  }
 0x279   : > { %v1680_v48 = vadd.f32 %v3204_v29, %v3092_v28  ;;  %2275 = vmatmul.mubr.bf16.gmra.mrb[140].mxu1 %v1925_v30  ;;  %v1874_v0 = vadd.f32 %v4208_v44, %v1677_v27 }
 0x27a   : > { %2282 = vmatprep.mubr.bf16.mxu1 %v4309_v46 }
 0x27b   : > { %v3093_v47 = vpop.f32.mrb[84].mxu1  ;;  %v3205_v49 = vpop.f32.mrb[84].mxu0  ;;  %v1875_v3 = vadd.f32 %v4208_v44, %v1680_v48  ;;  %v1906_v8 = vmax.f32 %v1874_v0, 0.0 }
 0x27c   : > { %v3094_v58 = vpop.f32.mrb[85].mxu1  ;;  %v3206_v59 = vpop.f32.mrb[85].mxu0 }
 0x27d   : > { %v3095_v60 = vadd.f32 %v3094_v58, %v3093_v47  ;;  %v3207_v31 = vadd.f32 %v3206_v59, %v3205_v49  ;;  %v3096_v4 = vpop.f32.mrb[86].mxu1  ;;  %v3208_v5 = vpop.f32.mrb[86].mxu0  ;;  %v1907_v12 = vmax.f32 %v1875_v3, 0.0 }
 0x27e   : > { %v3097_v6 = vpop.f32.mrb[87].mxu1  ;;  %v3209_v7 = vpop.f32.mrb[87].mxu0 }
 0x27f   : > { %v1685_v9 = vadd.f32 %v3207_v31, %v3095_v60  ;;  %v3098_v10 = vadd.f32 %v3097_v6, %v3096_v4  ;;  %v3210_v11 = vadd.f32 %v3209_v7, %v3208_v5  ;;  %v1926_v15 = vpack.c.bf16 %v1907_v12, %v1906_v8  ;;  %v4333_v31 = vld [vmem:[%s4180_s21 + $0x78] sm:$0xff]   ;;  %s2800_s21 = sshll.u32 %s4412_s25, 3 }
 0x280   : > { %s4357_s28 = scalar_lea.vmem %s4406_s6, %s2800_s21 }
 0x281   : > { %v1688_v14 = vadd.f32 %v3210_v11, %v3098_v10  ;;  %2283 = vmatmul.mubr.bf16.gmra.mrb[144].mxu1 %v1926_v15  ;;  %v1876_v18 = vadd.f32 %v4208_v44, %v1685_v9 }
 0x282   : > { %2290 = vmatprep.mubr.bf16.mxu1 %v4321_v13 }
 0x283   : > { %v3099_v16 = vpop.f32.mrb[88].mxu1  ;;  %v3211_v17 = vpop.f32.mrb[88].mxu0  ;;  %v1877_v35 = vadd.f32 %v4208_v44, %v1688_v14  ;;  %v1908_v38 = vmax.f32 %v1876_v18, 0.0 }
 0x284   : > { %v3100_v21 = vpop.f32.mrb[89].mxu1  ;;  %v3212_v23 = vpop.f32.mrb[89].mxu0 }
 0x285   : > { %v3101_v24 = vadd.f32 %v3100_v21, %v3099_v16  ;;  %v3213_v25 = vadd.f32 %v3212_v23, %v3211_v17  ;;  %v3102_v32 = vpop.f32.mrb[90].mxu1  ;;  %v3214_v34 = vpop.f32.mrb[90].mxu0  ;;  %v1909_v45 = vmax.f32 %v1877_v35, 0.0 }
 0x286   : > { %v3103_v36 = vpop.f32.mrb[91].mxu1  ;;  %v3215_v37 = vpop.f32.mrb[91].mxu0 }
 0x287   : > { %v1693_v39 = vadd.f32 %v3213_v25, %v3101_v24  ;;  %v3104_v40 = vadd.f32 %v3103_v36, %v3102_v32  ;;  %v3216_v41 = vadd.f32 %v3215_v37, %v3214_v34  ;;  %v1927_v56 = vpack.c.bf16 %v1909_v45, %v1908_v38 }
 0x289   : > { %v1696_v51 = vadd.f32 %v3216_v41, %v3104_v40  ;;  %2291 = vmatmul.mubr.bf16.gmra.mrb[148].mxu1 %v1927_v56  ;;  %v1878_v26 = vadd.f32 %v4208_v44, %v1693_v39 }
 0x28a   : > { %2298 = vmatprep.mubr.bf16.mxu1 %v4327_v50 }
 0x28b   : > { %v3105_v53 = vpop.f32.mrb[92].mxu1  ;;  %v3217_v62 = vpop.f32.mrb[92].mxu0  ;;  %v1879_v43 = vadd.f32 %v4208_v44, %v1696_v51  ;;  %v1910_v0 = vmax.f32 %v1878_v26, 0.0 }
 0x28c   : > { %v3106_v27 = vpop.f32.mrb[93].mxu1  ;;  %v3218_v28 = vpop.f32.mrb[93].mxu0 }
 0x28d   : > { %v3107_v29 = vadd.f32 %v3106_v27, %v3105_v53  ;;  %v3219_v42 = vadd.f32 %v3218_v28, %v3217_v62  ;;  %v3108_v48 = vpop.f32.mrb[94].mxu1  ;;  %v3220_v30 = vpop.f32.mrb[94].mxu0  ;;  %v1911_v60 = vmax.f32 %v1879_v43, 0.0 }
 0x28e   : > { %v3109_v47 = vpop.f32.mrb[95].mxu1  ;;  %v3221_v49 = vpop.f32.mrb[95].mxu0 }
 0x28f   : > { %v1701_v54 = vadd.f32 %v3219_v42, %v3107_v29  ;;  %v3110_v58 = vadd.f32 %v3109_v47, %v3108_v48  ;;  %v3222_v59 = vadd.f32 %v3221_v49, %v3220_v30  ;;  %v1928_v5 = vpack.c.bf16 %v1911_v60, %v1910_v0 }
 0x291   : > { %v1704_v4 = vadd.f32 %v3222_v59, %v3110_v58  ;;  %2299 = vmatmul.mubr.bf16.gmra.mrb[152].mxu1 %v1928_v5  ;;  %v1880_v3 = vadd.f32 %v4208_v44, %v1701_v54 }
 0x292   : > { %2306 = vmatprep.mubr.bf16.mxu1 %v4333_v31 }
 0x293   : > { %v1881_v6 = vadd.f32 %v4208_v44, %v1704_v4  ;;  %v1912_v7 = vmax.f32 %v1880_v3, 0.0 }
 0x295   : > { %v1913_v8 = vmax.f32 %v1881_v6, 0.0 }
 0x297   : > { %v1929_v9 = vpack.c.bf16 %v1913_v8, %v1912_v7 }
 0x299   : > { %2307 = vmatmul.mubr.bf16.gmra.mrb[156].mxu1 %v1929_v9 }
 0x2f4   : > { %v3239_v10 = vpop.f32.mrb[96].mxu1 }
 0x2f5   : > { %v3240_v11 = vpop.f32.mrb[97].mxu1 }
 0x2f6   : > { %v3241_v12 = vadd.f32 %v3240_v11, %v3239_v10  ;;  %v3242_v14 = vpop.f32.mrb[98].mxu1 }
 0x2f7   : > { %v3243_v15 = vpop.f32.mrb[99].mxu1 }
 0x2f8   : > { %v3244_v16 = vadd.f32 %v3243_v15, %v3242_v14  ;;  %v2315_v17 = vmax.f32 %v3241_v12, 0.0 }
 0x2fa   : > { %v2316_v18 = vmax.f32 %v3244_v16, 0.0 }
 0x2fc   : > { %v2347_v21 = vpack.c.bf16 %v2316_v18, %v2315_v17  ;;  %v3245_v23 = vpop.f32.mrb[100].mxu1 }
 0x2fd   : > { %v3246_v24 = vpop.f32.mrb[101].mxu1 }
 0x2fe   : > { %v3247_v25 = vadd.f32 %v3246_v24, %v3245_v23  ;;  %v3248_v32 = vpop.f32.mrb[102].mxu1  ;;  %2524 = vmatmul.mubr.bf16.vlgmr.msra.gmra.mrb[96].mxu0 %v2347_v21 }
 0x2ff   : > { %v3249_v34 = vpop.f32.mrb[103].mxu1  ;;  %2531 = vmatprep.mubr.bf16.mxu0 %v4228_v55 }
 0x300   : > { %v3250_v44 = vadd.f32 %v3249_v34, %v3248_v32  ;;  %v2317_v35 = vmax.f32 %v3247_v25, 0.0 }
 0x302   : > { %v2318_v36 = vmax.f32 %v3250_v44, 0.0 }
 0x304   : > { %v2348_v37 = vpack.c.bf16 %v2318_v36, %v2317_v35  ;;  %v3251_v38 = vpop.f32.mrb[104].mxu1 }
 0x305   : > { %v3252_v39 = vpop.f32.mrb[105].mxu1 }
 0x306   : > { %v3253_v40 = vadd.f32 %v3252_v39, %v3251_v38  ;;  %v3254_v41 = vpop.f32.mrb[106].mxu1  ;;  %2532 = vmatmul.mubr.bf16.gmra.mrb[100].mxu0 %v2348_v37 }
 0x307   : > { %v3255_v45 = vpop.f32.mrb[107].mxu1  ;;  %2539 = vmatprep.mubr.bf16.mxu0 %v4246_v20 }
 0x308   : > { %v3256_v51 = vadd.f32 %v3255_v45, %v3254_v41  ;;  %v2319_v56 = vmax.f32 %v3253_v40, 0.0 }
 0x30a   : > { %v2320_v53 = vmax.f32 %v3256_v51, 0.0 }
 0x30c   : > { %v2349_v62 = vpack.c.bf16 %v2320_v53, %v2319_v56  ;;  %v3257_v26 = vpop.f32.mrb[108].mxu1 }
 0x30d   : > { %v3258_v27 = vpop.f32.mrb[109].mxu1 }
 0x30e   : > { %v3259_v28 = vadd.f32 %v3258_v27, %v3257_v26  ;;  %v3260_v55 = vpop.f32.mrb[110].mxu1  ;;  %2540 = vmatmul.mubr.bf16.gmra.mrb[104].mxu0 %v2349_v62 }
 0x30f   : > { %v3261_v29 = vpop.f32.mrb[111].mxu1  ;;  %2547 = vmatprep.mubr.bf16.mxu0 %v4255_v52 }
 0x310   : > { %v3262_v42 = vadd.f32 %v3261_v29, %v3260_v55  ;;  %v2321_v48 = vmax.f32 %v3259_v28, 0.0 }
 0x312   : > { %v2322_v30 = vmax.f32 %v3262_v42, 0.0 }
 0x314   : > { %v2350_v43 = vpack.c.bf16 %v2322_v30, %v2321_v48  ;;  %v3263_v47 = vpop.f32.mrb[112].mxu1 }
 0x315   : > { %v3264_v49 = vpop.f32.mrb[113].mxu1 }
 0x316   : > { %v3265_v0 = vadd.f32 %v3264_v49, %v3263_v47  ;;  %v3266_v20 = vpop.f32.mrb[114].mxu1  ;;  %2548 = vmatmul.mubr.bf16.gmra.mrb[108].mxu0 %v2350_v43 }
 0x317   : > { %v3267_v54 = vpop.f32.mrb[115].mxu1  ;;  %2555 = vmatprep.mubr.bf16.mxu0 %v4261_v61 }
 0x318   : > { %v3268_v58 = vadd.f32 %v3267_v54, %v3266_v20  ;;  %v2323_v59 = vmax.f32 %v3265_v0, 0.0 }
 0x31a   : > { %v2324_v60 = vmax.f32 %v3268_v58, 0.0 }
 0x31c   : > { %v2351_v4 = vpack.c.bf16 %v2324_v60, %v2323_v59  ;;  %v3269_v5 = vpop.f32.mrb[116].mxu1 }
 0x31d   : > { %v3270_v3 = vpop.f32.mrb[117].mxu1 }
 0x31e   : > { %v3271_v6 = vadd.f32 %v3270_v3, %v3269_v5  ;;  %v3272_v52 = vpop.f32.mrb[118].mxu1  ;;  %2556 = vmatmul.mubr.bf16.gmra.mrb[112].mxu0 %v2351_v4 }
 0x31f   : > { %v3273_v7 = vpop.f32.mrb[119].mxu1  ;;  %2563 = vmatprep.mubr.bf16.mxu0 %v4267_v19 }
 0x320   : > { %v3274_v8 = vadd.f32 %v3273_v7, %v3272_v52  ;;  %v2325_v9 = vmax.f32 %v3271_v6, 0.0 }
 0x322   : > { %v2326_v10 = vmax.f32 %v3274_v8, 0.0 }
 0x324   : > { %v2352_v11 = vpack.c.bf16 %v2326_v10, %v2325_v9  ;;  %v3275_v12 = vpop.f32.mrb[120].mxu1 }
 0x325   : > { %v3276_v14 = vpop.f32.mrb[121].mxu1 }
 0x326   : > { %v3277_v15 = vadd.f32 %v3276_v14, %v3275_v12  ;;  %v3278_v61 = vpop.f32.mrb[122].mxu1  ;;  %2564 = vmatmul.mubr.bf16.gmra.mrb[116].mxu0 %v2352_v11 }
 0x327   : > { %v3279_v16 = vpop.f32.mrb[123].mxu1  ;;  %2571 = vmatprep.mubr.bf16.mxu0 %v4273_v57 }
 0x328   : > { %v3280_v17 = vadd.f32 %v3279_v16, %v3278_v61  ;;  %v2327_v18 = vmax.f32 %v3277_v15, 0.0 }
 0x32a   : > { %v2328_v21 = vmax.f32 %v3280_v17, 0.0 }
 0x32c   : > { %v2353_v23 = vpack.c.bf16 %v2328_v21, %v2327_v18  ;;  %v3281_v24 = vpop.f32.mrb[124].mxu1 }
 0x32d   : > { %v3282_v25 = vpop.f32.mrb[125].mxu1 }
 0x32e   : > { %v3283_v32 = vadd.f32 %v3282_v25, %v3281_v24  ;;  %v3284_v19 = vpop.f32.mrb[126].mxu1  ;;  %2572 = vmatmul.mubr.bf16.gmra.mrb[120].mxu0 %v2353_v23 }
 0x32f   : > { %v3285_v34 = vpop.f32.mrb[127].mxu1  ;;  %2579 = vmatprep.mubr.bf16.mxu0 %v4279_v1 }
 0x330   : > { %v3286_v44 = vadd.f32 %v3285_v34, %v3284_v19  ;;  %v2329_v35 = vmax.f32 %v3283_v32, 0.0 }
 0x332   : > { %v2330_v36 = vmax.f32 %v3286_v44, 0.0 }
 0x334   : > { %v2354_v37 = vpack.c.bf16 %v2330_v36, %v2329_v35  ;;  %v3287_v38 = vpop.f32.mrb[128].mxu1 }
 0x335   : > { %v3288_v39 = vpop.f32.mrb[129].mxu1 }
 0x336   : > { %v3289_v40 = vadd.f32 %v3288_v39, %v3287_v38  ;;  %v3290_v57 = vpop.f32.mrb[130].mxu1  ;;  %2580 = vmatmul.mubr.bf16.gmra.mrb[124].mxu0 %v2354_v37 }
 0x337   : > { %v3291_v41 = vpop.f32.mrb[131].mxu1  ;;  %2587 = vmatprep.mubr.bf16.mxu0 %v4285_v22 }
 0x338   : > { %v3292_v45 = vadd.f32 %v3291_v41, %v3290_v57  ;;  %v2331_v51 = vmax.f32 %v3289_v40, 0.0 }
 0x33a   : > { %v2332_v56 = vmax.f32 %v3292_v45, 0.0 }
 0x33c   : > { %v2355_v53 = vpack.c.bf16 %v2332_v56, %v2331_v51  ;;  %v3293_v62 = vpop.f32.mrb[132].mxu1 }
 0x33d   : > { %v3294_v26 = vpop.f32.mrb[133].mxu1 }
 0x33e   : > { %v3295_v27 = vadd.f32 %v3294_v26, %v3293_v62  ;;  %v3296_v1 = vpop.f32.mrb[134].mxu1  ;;  %2588 = vmatmul.mubr.bf16.gmra.mrb[128].mxu0 %v2355_v53 }
 0x33f   : > { %v3297_v28 = vpop.f32.mrb[135].mxu1  ;;  %2595 = vmatprep.mubr.bf16.mxu0 %v4291_v63 }
 0x340   : > { %v3298_v55 = vadd.f32 %v3297_v28, %v3296_v1  ;;  %v2333_v29 = vmax.f32 %v3295_v27, 0.0 }
 0x342   : > { %v2334_v42 = vmax.f32 %v3298_v55, 0.0 }
 0x344   : > { %v2356_v48 = vpack.c.bf16 %v2334_v42, %v2333_v29  ;;  %v3299_v30 = vpop.f32.mrb[136].mxu1 }
 0x345   : > { %v3300_v43 = vpop.f32.mrb[137].mxu1 }
 0x346   : > { %v3301_v47 = vadd.f32 %v3300_v43, %v3299_v30  ;;  %v3302_v22 = vpop.f32.mrb[138].mxu1  ;;  %2596 = vmatmul.mubr.bf16.gmra.mrb[132].mxu0 %v2356_v48 }
 0x347   : > { %v3303_v49 = vpop.f32.mrb[139].mxu1  ;;  %2603 = vmatprep.mubr.bf16.mxu0 %v4297_v2 }
 0x348   : > { %v3304_v0 = vadd.f32 %v3303_v49, %v3302_v22  ;;  %v2335_v20 = vmax.f32 %v3301_v47, 0.0 }
 0x34a   : > { %v2336_v54 = vmax.f32 %v3304_v0, 0.0 }
 0x34c   : > { %v2357_v58 = vpack.c.bf16 %v2336_v54, %v2335_v20  ;;  %v3305_v59 = vpop.f32.mrb[140].mxu1 }
 0x34d   : > { %v3306_v60 = vpop.f32.mrb[141].mxu1 }
 0x34e   : > { %v3307_v4 = vadd.f32 %v3306_v60, %v3305_v59  ;;  %v3308_v63 = vpop.f32.mrb[142].mxu1  ;;  %2604 = vmatmul.mubr.bf16.gmra.mrb[136].mxu0 %v2357_v58 }
 0x34f   : > { %v3309_v5 = vpop.f32.mrb[143].mxu1  ;;  %2611 = vmatprep.mubr.bf16.mxu0 %v4303_v33 }
 0x350   : > { %v3310_v3 = vadd.f32 %v3309_v5, %v3308_v63  ;;  %v2337_v6 = vmax.f32 %v3307_v4, 0.0 }
 0x352   : > { %v2338_v52 = vmax.f32 %v3310_v3, 0.0 }
 0x354   : > { %v2358_v7 = vpack.c.bf16 %v2338_v52, %v2337_v6  ;;  %v3311_v8 = vpop.f32.mrb[144].mxu1 }
 0x355   : > { %v3312_v9 = vpop.f32.mrb[145].mxu1 }
 0x356   : > { %v3313_v10 = vadd.f32 %v3312_v9, %v3311_v8  ;;  %v3314_v2 = vpop.f32.mrb[146].mxu1  ;;  %2612 = vmatmul.mubr.bf16.gmra.mrb[140].mxu0 %v2358_v7 }
 0x357   : > { %v3315_v11 = vpop.f32.mrb[147].mxu1  ;;  %2619 = vmatprep.mubr.bf16.mxu0 %v4309_v46 }
 0x358   : > { %v3316_v12 = vadd.f32 %v3315_v11, %v3314_v2  ;;  %v2339_v14 = vmax.f32 %v3313_v10, 0.0 }
 0x35a   : > { %v2340_v15 = vmax.f32 %v3316_v12, 0.0 }
 0x35c   : > { %v2359_v61 = vpack.c.bf16 %v2340_v15, %v2339_v14  ;;  %v3317_v16 = vpop.f32.mrb[148].mxu1 }
 0x35d   : > { %v3318_v17 = vpop.f32.mrb[149].mxu1 }
 0x35e   : > { %v3319_v18 = vadd.f32 %v3318_v17, %v3317_v16  ;;  %v3320_v33 = vpop.f32.mrb[150].mxu1  ;;  %2620 = vmatmul.mubr.bf16.gmra.mrb[144].mxu0 %v2359_v61 }
 0x35f   : > { %v3321_v21 = vpop.f32.mrb[151].mxu1  ;;  %2627 = vmatprep.mubr.bf16.mxu0 %v4321_v13 }
 0x360   : > { %v3322_v23 = vadd.f32 %v3321_v21, %v3320_v33  ;;  %v2341_v24 = vmax.f32 %v3319_v18, 0.0 }
 0x362   : > { %v2342_v25 = vmax.f32 %v3322_v23, 0.0 }
 0x364   : > { %v2360_v32 = vpack.c.bf16 %v2342_v25, %v2341_v24  ;;  %v3323_v19 = vpop.f32.mrb[152].mxu1 }
 0x365   : > { %v3324_v34 = vpop.f32.mrb[153].mxu1 }
 0x366   : > { %v3325_v44 = vadd.f32 %v3324_v34, %v3323_v19  ;;  %v3326_v46 = vpop.f32.mrb[154].mxu1  ;;  %2628 = vmatmul.mubr.bf16.gmra.mrb[148].mxu0 %v2360_v32 }
 0x367   : > { %v3327_v35 = vpop.f32.mrb[155].mxu1  ;;  %2635 = vmatprep.mubr.bf16.mxu0 %v4327_v50 }
 0x368   : > { %v3328_v36 = vadd.f32 %v3327_v35, %v3326_v46  ;;  %v2343_v37 = vmax.f32 %v3325_v44, 0.0 }
 0x36a   : > { %v2344_v38 = vmax.f32 %v3328_v36, 0.0 }
 0x36c   : > { %v2361_v39 = vpack.c.bf16 %v2344_v38, %v2343_v37  ;;  %v3329_v40 = vpop.f32.mrb[156].mxu1 }
 0x36d   : > { %v3330_v57 = vpop.f32.mrb[157].mxu1 }
 0x36e   : > { %v3331_v13 = vadd.f32 %v3330_v57, %v3329_v40  ;;  %v3332_v41 = vpop.f32.mrb[158].mxu1  ;;  %2636 = vmatmul.mubr.bf16.gmra.mrb[152].mxu0 %v2361_v39 }
 0x36f   : > { %v3333_v45 = vpop.f32.mrb[159].mxu1  ;;  %2643 = vmatprep.mubr.bf16.mxu0 %v4333_v31 }
 0x370   : > { %v3334_v51 = vadd.f32 %v3333_v45, %v3332_v41  ;;  %v2345_v56 = vmax.f32 %v3331_v13, 0.0 }
 0x372   : > { %v2346_v53 = vmax.f32 %v3334_v51, 0.0 }
 0x374   : > { %v2362_v62 = vpack.c.bf16 %v2346_v53, %v2345_v56 }
 0x376   : > { %2644 = vmatmul.mubr.bf16.gmra.mrb[156].mxu0 %v2362_v62 }
 0x3d1   : > { %v3351_v50 = vpop.f32.mrb[96].mxu0 }
 0x3d2   : > { %v3352_v26 = vpop.f32.mrb[97].mxu0 }
 0x3d3   : > { %v3353_v27 = vadd.f32 %v3352_v26, %v3351_v50  ;;  %v3354_v1 = vpop.f32.mrb[98].mxu0 }
 0x3d4   : > { %v3355_v31 = vpop.f32.mrb[99].mxu0 }
 0x3d5   : > { %v2652_v28 = vmax.f32 %v3353_v27, 0.0  ;;  %v3356_v55 = vadd.f32 %v3355_v31, %v3354_v1 }
 0x3d7   : > { %2684 = vst [vmem:[%s4357_s28] sm:$0xff] %v2652_v28  ;;  %v2653_v29 = vmax.f32 %v3356_v55, 0.0 }
 0x3d9   : > { %2685 = vst [vmem:[%s4357_s28 + $0x8] sm:$0xff] %v2653_v29  ;;  %v3357_v42 = vpop.f32.mrb[100].mxu0 }
 0x3da   : > { %v3358_v48 = vpop.f32.mrb[101].mxu0 }
 0x3db   : > { %v3359_v30 = vadd.f32 %v3358_v48, %v3357_v42  ;;  %v3360_v43 = vpop.f32.mrb[102].mxu0 }
 0x3dc   : > { %v3361_v47 = vpop.f32.mrb[103].mxu0 }
 0x3dd   : > { %v2654_v22 = vmax.f32 %v3359_v30, 0.0  ;;  %v3362_v49 = vadd.f32 %v3361_v47, %v3360_v43 }
 0x3df   : > { %2686 = vst [vmem:[%s4357_s28 + $0x10] sm:$0xff] %v2654_v22  ;;  %v2655_v0 = vmax.f32 %v3362_v49, 0.0 }
 0x3e1   : > { %2687 = vst [vmem:[%s4357_s28 + $0x18] sm:$0xff] %v2655_v0  ;;  %v3363_v20 = vpop.f32.mrb[104].mxu0 }
 0x3e2   : > { %v3364_v54 = vpop.f32.mrb[105].mxu0 }
 0x3e3   : > { %v3365_v58 = vadd.f32 %v3364_v54, %v3363_v20  ;;  %v3366_v59 = vpop.f32.mrb[106].mxu0 }
 0x3e4   : > { %v3367_v60 = vpop.f32.mrb[107].mxu0 }
 0x3e5   : > { %v2656_v4 = vmax.f32 %v3365_v58, 0.0  ;;  %v3368_v63 = vadd.f32 %v3367_v60, %v3366_v59 }
 0x3e7   : > { %2688 = vst [vmem:[%s4357_s28 + $0x20] sm:$0xff] %v2656_v4  ;;  %v2657_v5 = vmax.f32 %v3368_v63, 0.0 }
 0x3e9   : > { %2689 = vst [vmem:[%s4357_s28 + $0x28] sm:$0xff] %v2657_v5  ;;  %v3369_v3 = vpop.f32.mrb[108].mxu0 }
 0x3ea   : > { %v3370_v6 = vpop.f32.mrb[109].mxu0 }
 0x3eb   : > { %v3371_v52 = vadd.f32 %v3370_v6, %v3369_v3  ;;  %v3372_v7 = vpop.f32.mrb[110].mxu0 }
 0x3ec   : > { %v3373_v8 = vpop.f32.mrb[111].mxu0 }
 0x3ed   : > { %v2658_v9 = vmax.f32 %v3371_v52, 0.0  ;;  %v3374_v10 = vadd.f32 %v3373_v8, %v3372_v7 }
 0x3ef   : > { %2690 = vst [vmem:[%s4357_s28 + $0x30] sm:$0xff] %v2658_v9  ;;  %v2659_v2 = vmax.f32 %v3374_v10, 0.0 }
 0x3f1   : > { %2691 = vst [vmem:[%s4357_s28 + $0x38] sm:$0xff] %v2659_v2  ;;  %v3375_v11 = vpop.f32.mrb[112].mxu0 }
 0x3f2   : > { %v3376_v12 = vpop.f32.mrb[113].mxu0 }
 0x3f3   : > { %v3377_v14 = vadd.f32 %v3376_v12, %v3375_v11  ;;  %v3378_v15 = vpop.f32.mrb[114].mxu0 }
 0x3f4   : > { %v3379_v61 = vpop.f32.mrb[115].mxu0 }
 0x3f5   : > { %v2660_v16 = vmax.f32 %v3377_v14, 0.0  ;;  %v3380_v17 = vadd.f32 %v3379_v61, %v3378_v15 }
 0x3f7   : > { %2692 = vst [vmem:[%s4357_s28 + $0x40] sm:$0xff] %v2660_v16  ;;  %v2661_v18 = vmax.f32 %v3380_v17, 0.0 }
 0x3f9   : > { %2693 = vst [vmem:[%s4357_s28 + $0x48] sm:$0xff] %v2661_v18  ;;  %v3381_v33 = vpop.f32.mrb[116].mxu0 }
 0x3fa   : > { %v3382_v21 = vpop.f32.mrb[117].mxu0 }
 0x3fb   : > { %v3383_v23 = vadd.f32 %v3382_v21, %v3381_v33  ;;  %v3384_v24 = vpop.f32.mrb[118].mxu0 }
 0x3fc   : > { %v3385_v25 = vpop.f32.mrb[119].mxu0 }
 0x3fd   : > { %v2662_v32 = vmax.f32 %v3383_v23, 0.0  ;;  %v3386_v19 = vadd.f32 %v3385_v25, %v3384_v24 }
 0x3ff   : > { %2694 = vst [vmem:[%s4357_s28 + $0x50] sm:$0xff] %v2662_v32  ;;  %v2663_v34 = vmax.f32 %v3386_v19, 0.0 }
 0x401   : > { %2695 = vst [vmem:[%s4357_s28 + $0x58] sm:$0xff] %v2663_v34  ;;  %v3387_v44 = vpop.f32.mrb[120].mxu0 }
 0x402   : > { %v3388_v46 = vpop.f32.mrb[121].mxu0 }
 0x403   : > { %v3389_v35 = vadd.f32 %v3388_v46, %v3387_v44  ;;  %v3390_v36 = vpop.f32.mrb[122].mxu0 }
 0x404   : > { %v3391_v37 = vpop.f32.mrb[123].mxu0 }
 0x405   : > { %v2664_v38 = vmax.f32 %v3389_v35, 0.0  ;;  %v3392_v39 = vadd.f32 %v3391_v37, %v3390_v36 }
 0x407   : > { %2696 = vst [vmem:[%s4357_s28 + $0x60] sm:$0xff] %v2664_v38  ;;  %v2665_v40 = vmax.f32 %v3392_v39, 0.0 }
 0x409   : > { %2697 = vst [vmem:[%s4357_s28 + $0x68] sm:$0xff] %v2665_v40  ;;  %v3393_v57 = vpop.f32.mrb[124].mxu0 }
 0x40a   : > { %v3394_v13 = vpop.f32.mrb[125].mxu0 }
 0x40b   : > { %v3395_v41 = vadd.f32 %v3394_v13, %v3393_v57  ;;  %v3396_v45 = vpop.f32.mrb[126].mxu0 }
 0x40c   : > { %v3397_v51 = vpop.f32.mrb[127].mxu0 }
 0x40d   : > { %v2666_v56 = vmax.f32 %v3395_v41, 0.0  ;;  %v3398_v53 = vadd.f32 %v3397_v51, %v3396_v45 }
 0x40f   : > { %2698 = vst [vmem:[%s4357_s28 + $0x70] sm:$0xff] %v2666_v56  ;;  %v2667_v62 = vmax.f32 %v3398_v53, 0.0 }
 0x411   : > { %2699 = vst [vmem:[%s4357_s28 + $0x78] sm:$0xff] %v2667_v62  ;;  %v3399_v50 = vpop.f32.mrb[128].mxu0 }
 0x412   : > { %v3400_v26 = vpop.f32.mrb[129].mxu0 }
 0x413   : > { %v3401_v27 = vadd.f32 %v3400_v26, %v3399_v50  ;;  %v3402_v1 = vpop.f32.mrb[130].mxu0 }
 0x414   : > { %v3403_v31 = vpop.f32.mrb[131].mxu0 }
 0x415   : > { %v2668_v28 = vmax.f32 %v3401_v27, 0.0  ;;  %v3404_v55 = vadd.f32 %v3403_v31, %v3402_v1 }
 0x417   : > { %2700 = vst [vmem:[%s4357_s28 + $0x80] sm:$0xff] %v2668_v28  ;;  %v2669_v29 = vmax.f32 %v3404_v55, 0.0 }
 0x419   : > { %2701 = vst [vmem:[%s4357_s28 + $0x88] sm:$0xff] %v2669_v29  ;;  %v3405_v42 = vpop.f32.mrb[132].mxu0 }
 0x41a   : > { %v3406_v48 = vpop.f32.mrb[133].mxu0 }
 0x41b   : > { %v3407_v30 = vadd.f32 %v3406_v48, %v3405_v42  ;;  %v3408_v43 = vpop.f32.mrb[134].mxu0 }
 0x41c   : > { %v3409_v47 = vpop.f32.mrb[135].mxu0 }
 0x41d   : > { %v2670_v22 = vmax.f32 %v3407_v30, 0.0  ;;  %v3410_v49 = vadd.f32 %v3409_v47, %v3408_v43 }
 0x41f   : > { %2702 = vst [vmem:[%s4357_s28 + $0x90] sm:$0xff] %v2670_v22  ;;  %v2671_v0 = vmax.f32 %v3410_v49, 0.0 }
 0x421   : > { %2703 = vst [vmem:[%s4357_s28 + $0x98] sm:$0xff] %v2671_v0  ;;  %v3411_v20 = vpop.f32.mrb[136].mxu0 }
 0x422   : > { %v3412_v54 = vpop.f32.mrb[137].mxu0 }
 0x423   : > { %v3413_v58 = vadd.f32 %v3412_v54, %v3411_v20  ;;  %v3414_v59 = vpop.f32.mrb[138].mxu0 }
 0x424   : > { %v3415_v60 = vpop.f32.mrb[139].mxu0 }
 0x425   : > { %v2672_v4 = vmax.f32 %v3413_v58, 0.0  ;;  %v3416_v63 = vadd.f32 %v3415_v60, %v3414_v59 }
 0x427   : > { %2704 = vst [vmem:[%s4357_s28 + $0xa0] sm:$0xff] %v2672_v4  ;;  %v2673_v5 = vmax.f32 %v3416_v63, 0.0 }
 0x429   : > { %2705 = vst [vmem:[%s4357_s28 + $0xa8] sm:$0xff] %v2673_v5  ;;  %v3417_v3 = vpop.f32.mrb[140].mxu0 }
 0x42a   : > { %v3418_v6 = vpop.f32.mrb[141].mxu0 }
 0x42b   : > { %v3419_v52 = vadd.f32 %v3418_v6, %v3417_v3  ;;  %v3420_v7 = vpop.f32.mrb[142].mxu0 }
 0x42c   : > { %v3421_v8 = vpop.f32.mrb[143].mxu0 }
 0x42d   : > { %v2674_v9 = vmax.f32 %v3419_v52, 0.0  ;;  %v3422_v10 = vadd.f32 %v3421_v8, %v3420_v7 }
 0x42f   : > { %2706 = vst [vmem:[%s4357_s28 + $0xb0] sm:$0xff] %v2674_v9  ;;  %v2675_v2 = vmax.f32 %v3422_v10, 0.0 }
 0x431   : > { %2707 = vst [vmem:[%s4357_s28 + $0xb8] sm:$0xff] %v2675_v2  ;;  %v3423_v11 = vpop.f32.mrb[144].mxu0 }
 0x432   : > { %v3424_v12 = vpop.f32.mrb[145].mxu0 }
 0x433   : > { %v3425_v14 = vadd.f32 %v3424_v12, %v3423_v11  ;;  %v3426_v15 = vpop.f32.mrb[146].mxu0 }
 0x434   : > { %v3427_v61 = vpop.f32.mrb[147].mxu0 }
 0x435   : > { %v2676_v16 = vmax.f32 %v3425_v14, 0.0  ;;  %v3428_v17 = vadd.f32 %v3427_v61, %v3426_v15 }
 0x437   : > { %2708 = vst [vmem:[%s4357_s28 + $0xc0] sm:$0xff] %v2676_v16  ;;  %v2677_v18 = vmax.f32 %v3428_v17, 0.0 }
 0x439   : > { %2709 = vst [vmem:[%s4357_s28 + $0xc8] sm:$0xff] %v2677_v18  ;;  %v3429_v33 = vpop.f32.mrb[148].mxu0 }
 0x43a   : > { %v3430_v21 = vpop.f32.mrb[149].mxu0 }
 0x43b   : > { %v3431_v23 = vadd.f32 %v3430_v21, %v3429_v33  ;;  %v3432_v24 = vpop.f32.mrb[150].mxu0 }
 0x43c   : > { %v3433_v25 = vpop.f32.mrb[151].mxu0 }
 0x43d   : > { %v2678_v32 = vmax.f32 %v3431_v23, 0.0  ;;  %v3434_v19 = vadd.f32 %v3433_v25, %v3432_v24 }
 0x43f   : > { %2710 = vst [vmem:[%s4357_s28 + $0xd0] sm:$0xff] %v2678_v32  ;;  %v2679_v34 = vmax.f32 %v3434_v19, 0.0 }
 0x441   : > { %2711 = vst [vmem:[%s4357_s28 + $0xd8] sm:$0xff] %v2679_v34  ;;  %v3435_v44 = vpop.f32.mrb[152].mxu0 }
 0x442   : > { %v3436_v46 = vpop.f32.mrb[153].mxu0 }
 0x443   : > { %v3437_v35 = vadd.f32 %v3436_v46, %v3435_v44  ;;  %v3438_v36 = vpop.f32.mrb[154].mxu0 }
 0x444   : > { %v3439_v37 = vpop.f32.mrb[155].mxu0 }
 0x445   : > { %v2680_v38 = vmax.f32 %v3437_v35, 0.0  ;;  %v3440_v39 = vadd.f32 %v3439_v37, %v3438_v36 }
 0x447   : > { %2712 = vst [vmem:[%s4357_s28 + $0xe0] sm:$0xff] %v2680_v38  ;;  %v2681_v40 = vmax.f32 %v3440_v39, 0.0 }
 0x449   : > { %2713 = vst [vmem:[%s4357_s28 + $0xe8] sm:$0xff] %v2681_v40  ;;  %v3441_v57 = vpop.f32.mrb[156].mxu0 }
 0x44a   : > { %v3442_v13 = vpop.f32.mrb[157].mxu0 }
 0x44b   : > { %v3443_v41 = vadd.f32 %v3442_v13, %v3441_v57  ;;  %v3444_v45 = vpop.f32.mrb[158].mxu0 }
 0x44c   : > { %v3445_v51 = vpop.f32.mrb[159].mxu0 }
 0x44d   : > { %v2682_v56 = vmax.f32 %v3443_v41, 0.0  ;;  %v3446_v53 = vadd.f32 %v3445_v51, %v3444_v45 }
 0x44f   : > { %2714 = vst [vmem:[%s4357_s28 + $0xf0] sm:$0xff] %v2682_v56  ;;  %v2683_v62 = vmax.f32 %v3446_v53, 0.0 }
 0x451   : > { %2715 = vst [vmem:[%s4357_s28 + $0xf8] sm:$0xff] %v2683_v62 }
 0x452 PF: > { %s16_s23 = sadd.s32 1, %s3774_s23   ;;  %s4407_s21 = smov %s3770_s22 }
 0x453   : > { %p13_p5 = scmp.ge.s32.totalorder %s16_s23, 4   ;;  %s4408_s22 = smov %s4410_s24 }
 0x455   :  { %15 = sbr.rel (!%p13_p5) target bundleno = 2 (0x2), region = 84 }

</bundles_post_ra>
